<compile_context>
chip_gen: v6e
topology: v6e:2x2x1
jax: 0.10.0
libtpu: 0.0.40
codegen_flags: <defaults>
</compile_context>

<pallas_src>
import jax
import jax.numpy as jnp
from jax import lax
from jax.experimental import pallas as pl
from jax.experimental.pallas import tpu as pltpu

EPS = 1e-6


# --------------------------- helpers traced inside the kernel ---------------------------

def _permute3(x, eq):
    """Rank-3 permutation; prefer the layout-aware pltpu.einshape."""
    if hasattr(pltpu, "einshape"):
        return pltpu.einshape(eq, x)
    src, dst = eq.split("->")
    return jnp.transpose(x, tuple(src.index(c) for c in dst))


def _layernorm(x, g, b):
    # PyTorch LayerNorm reference: mean(-1), unbiased std (ddof=1), divide by (std + eps).
    d = x.shape[-1]
    mean = jnp.mean(x, axis=-1, keepdims=True)
    var = jnp.sum((x - mean) ** 2, axis=-1, keepdims=True) / (d - 1)
    return g * (x - mean) / (jnp.sqrt(var) + EPS) + b


def _split_heads(q, n_heads):
    tq, d = q.shape
    return _permute3(q.reshape(tq, n_heads, d // n_heads), "qhk->hqk")   # (H, TQ, dk)


def _merge_heads(ctx):
    h, tq, dk = ctx.shape
    return _permute3(ctx, "hqk->qhk").reshape(tq, h * dk)                # (TQ, D)


def _attention(xq_bf16, k, v, w_q, b_q, w_o, b_o, bias, n_heads):
    """One query-row tile of multi-head attention against precomputed K/V.

    xq_bf16: (TQ, D) bf16; k, v: (H, S, dk) bf16; w_q, w_o: (D, D) bf16
    (1/sqrt(dk) already folded into w_q/b_q); b_q, b_o: (1, D) f32;
    bias: (TQ, S) f32 additive mask bias or None.
    """
    f32 = jnp.float32
    # Lane-dense fused Q projection (single (TQ,D)x(D,D) MXU matmul, f32 accumulate).
    q = jnp.dot(xq_bf16, w_q, preferred_element_type=f32) + b_q          # (TQ, D)
    qh = _split_heads(q, n_heads).astype(jnp.bfloat16)                   # (H, TQ, dk)

    # Leading-batch einsums on the MXU.
    s = jnp.einsum("hqk,hsk->hqs", qh, k, preferred_element_type=f32)    # (H, TQ, S)
    if bias is not None:
        s = s + bias[None, :, :]

    # Softmax in f32; the denominator reciprocal runs on the (otherwise idle) EUP.
    m = jnp.max(s, axis=-1, keepdims=True)
    e = jnp.exp(s - m)
    p = e * pl.reciprocal(jnp.sum(e, axis=-1, keepdims=True), approx=True)

    ctx = jnp.einsum("hqs,hsk->hqk", p.astype(jnp.bfloat16), v,
                     preferred_element_type=f32)                         # (H, TQ, dk)

    # Lane-dense fused output projection: (TQ, H*dk) x (D, D); no VPU head-sum.
    ctx2 = _merge_heads(ctx).astype(jnp.bfloat16)                        # (TQ, D)
    return jnp.dot(ctx2, w_o, preferred_element_type=f32) + b_o          # (TQ, D)


# --------------------------------------- kernel ---------------------------------------

def _make_kernel(n_heads, q_tile, causal_tgt, full_src):
    def kernel(*refs):
        refs = list(refs)
        xq_ref = refs.pop(0)                     # (TQ, D)   bf16 query rows
        ks_ref = refs.pop(0)                     # (H, T, dk) bf16 self-attn K
        vs_ref = refs.pop(0)                     # (H, T, dk) bf16 self-attn V
        kc_ref = refs.pop(0)                     # (H, S, dk) bf16 cross-attn K
        vc_ref = refs.pop(0)                     # (H, S, dk) bf16 cross-attn V
        tmask_ref = None if causal_tgt else refs.pop(0)   # (TQ, T) bf16 {0,1}
        smask_ref = None if full_src else refs.pop(0)     # (TQ, S) bf16 {0,1}
        (wq_ref, bq_ref, wo_ref, bo_ref,
         w1_ref, b1_ref, w2_ref, b2_ref,
         lng_ref, lnb_ref, out_ref) = refs

        f32 = jnp.float32
        xq_bf = xq_ref[...]                      # bf16 (boundary cast)
        xq = xq_bf.astype(f32)                   # residual / LN path in f32

        # ---- target (self-attn) mask bias ----
        t_len = ks_ref.shape[1]
        if causal_tgt:
            # Causal bias generated in-kernel: no O(B*T^2) mask HBM traffic.
            row = (lax.broadcasted_iota(jnp.int32, (q_tile, t_len), 0)
                   + pl.program_id(1) * q_tile)
            col = lax.broadcasted_iota(jnp.int32, (q_tile, t_len), 1)
            tbias = jnp.where(col <= row, 0.0, -1e9).astype(f32)
        else:
            tbias = (tmask_ref[...].astype(f32) - 1.0) * 1e9
        # ---- source (cross-attn) mask bias ----
        sbias = None if full_src else (smask_ref[...].astype(f32) - 1.0) * 1e9

        # ---- sublayer 0: masked self-attention + residual + LayerNorm ----
        sa = _attention(xq_bf, ks_ref[...], vs_ref[...],
                        wq_ref[0], bq_ref[0], wo_ref[0], bo_ref[0], tbias, n_heads)
        h0 = _layernorm(xq + sa, lng_ref[0], lnb_ref[0])

        # ---- sublayer 1: source (cross) attention + residual + LayerNorm ----
        ca = _attention(h0.astype(jnp.bfloat16), kc_ref[...], vc_ref[...],
                        wq_ref[1], bq_ref[1], wo_ref[1], bo_ref[1], sbias, n_heads)
        h1 = _layernorm(h0 + ca, lng_ref[1], lnb_ref[1])

        # ---- sublayer 2: position-wise feed-forward + residual + LayerNorm ----
        hid = jnp.maximum(
            jnp.dot(h1.astype(jnp.bfloat16), w1_ref[...],
                    preferred_element_type=f32) + b1_ref[...], 0.0)
        ff = jnp.dot(hid.astype(jnp.bfloat16), w2_ref[...],
                     preferred_element_type=f32) + b2_ref[...]
        out_ref[...] = _layernorm(h1 + ff, lng_ref[2], lnb_ref[2]).astype(out_ref.dtype)

    return kernel


# --------------------------------------- wrapper ---------------------------------------

def _vmem_budget_bytes():
    # Per-generation VMEM budget: ~3/4 of physical capacity, capped.  Leaves headroom
    # on v7x (64 MiB per core) while using more of v5e/v6e's 128 MiB.
    try:
        cap = int(pltpu.get_tpu_info().vmem_capacity_bytes)
    except Exception:
        return None   # fall back to the compiler default
    return min(cap * 3 // 4, 112 * 1024 * 1024)


def decoder_layer(x, memory, tgt_mask, src_mask, params, *, n_heads,
                  q_tile=None, causal_tgt=False, full_src=False):
    """DecoderLayer forward (eval mode: dropout = identity).

    causal_tgt=True: generate the causal target mask in-kernel (tgt_mask ignored).
    full_src=True:   skip the source mask entirely (src_mask ignored).
    Otherwise masks are streamed ({0,1}-valued, bf16) and applied as additive bias.
    """
    B, T, D = x.shape
    S = memory.shape[1]
    DFF = params["w1"].shape[1]
    assert D % n_heads == 0
    dk = D // n_heads
    TQ = q_tile if q_tile is not None else min(T, 128)   # 256 is a good choice on v6e
    assert T % TQ == 0, "T must be divisible by the query-row tile"

    bf16 = jnp.bfloat16
    aw, ab = params["attn_w"], params["attn_b"]   # (2,4,D,D) / (2,4,1,D); [self,cross] x [q,k,v,o]
    scale = float(dk) ** -0.5

    # ---- one-time wrapper-side prep: fold scale into Q projection, bf16 weights ----
    w_q = (aw[:, 0] * scale).astype(bf16)          # (2, D, D)
    b_q = ab[:, 0] * scale                         # (2, 1, D) f32
    w_o = aw[:, 3].astype(bf16)                    # (2, D, D)
    b_o = ab[:, 3]                                 # (2, 1, D) f32
    w1 = params["w1"].astype(bf16)
    b1 = params["b1"]
    w2 = params["w2"].astype(bf16)
    b2 = params["b2"]
    ln_g, ln_b = params["ln_g"], params["ln_b"]

    # ---- K/V projected ONCE per sequence (hoisted out of the query-tile loop) ----
    def kv(src, w_k, b_k, w_v, b_v):
        bs, ss, _ = src.shape
        k = (src @ w_k + b_k).reshape(bs, ss, n_heads, dk).transpose(0, 2, 1, 3)
        v = (src @ w_v + b_v).reshape(bs, ss, n_heads, dk).transpose(0, 2, 1, 3)
        return k.astype(bf16), v.astype(bf16)      # (B, H, S, dk) bf16

    k_self, v_self = kv(x, aw[0, 1], ab[0, 1], aw[0, 2], ab[0, 2])
    k_cross, v_cross = kv(memory, aw[1, 1], ab[1, 1], aw[1, 2], ab[1, 2])

    x_bf = x.astype(bf16)                          # activations cross the boundary in bf16

    operands = [x_bf, k_self, v_self, k_cross, v_cross]
    in_specs = [
        pl.BlockSpec((None, TQ, D), lambda b, t: (b, t, 0)),           # query rows
        pl.BlockSpec((None, n_heads, T, dk), lambda b, t: (b, 0, 0, 0)),
        pl.BlockSpec((None, n_heads, T, dk), lambda b, t: (b, 0, 0, 0)),
        pl.BlockSpec((None, n_heads, S, dk), lambda b, t: (b, 0, 0, 0)),
        pl.BlockSpec((None, n_heads, S, dk), lambda b, t: (b, 0, 0, 0)),
    ]
    if not causal_tgt:
        operands.append(tgt_mask.astype(bf16))     # {0,1} exact in bf16
        in_specs.append(pl.BlockSpec((None, TQ, T), lambda b, t: (b, t, 0)))
    if not full_src:
        operands.append(src_mask.astype(bf16))
        in_specs.append(pl.BlockSpec((None, TQ, S), lambda b, t: (b, t, 0)))

    def const_spec(shape):
        nd = len(shape)
        # Constant-per-grid-step operands: block index never changes -> no re-DMA.
        return pl.BlockSpec(shape, lambda b, t, _n=nd: (0,) * _n)

    weights = [w_q, b_q, w_o, b_o, w1, b1, w2, b2, ln_g, ln_b]
    operands += weights
    in_specs += [const_spec(tuple(w.shape)) for w in weights]

    kernel = _make_kernel(n_heads, TQ, causal_tgt, full_src)

    return pl.pallas_call(
        kernel,
        out_shape=jax.ShapeDtypeStruct((B, T, D), jnp.float32),
        grid_spec=pltpu.PrefetchScalarGridSpec(
            num_scalar_prefetch=0,
            grid=(B, T // TQ),                    # batch x query-row tiles (keep >= 2 steps on v7x)
            in_specs=in_specs,
            out_specs=pl.BlockSpec((None, TQ, D), lambda b, t: (b, t, 0)),
        ),
        compiler_params=pltpu.CompilerParams(
            dimension_semantics=("parallel", "parallel"),
            vmem_limit_bytes=_vmem_budget_bytes(),
        ),
    )(*operands)


# ------------------------------ pure-JAX f32 reference (for checking) ------------------------------

def _ref_layernorm(x, g, b):
    d = x.shape[-1]
    mean = jnp.mean(x, axis=-1, keepdims=True)
    std = jnp.sqrt(jnp.sum((x - mean) ** 2, axis=-1, keepdims=True) / (d - 1))
    return g * (x - mean) / (std + EPS) + b


def _ref_mha(xq, xkv, w, b, mask, n_heads):
    B, T, D = xq.shape
    S = xkv.shape[1]
    dk = D // n_heads
    q = (xq @ w[0] + b[0]).reshape(B, T, n_heads, dk).transpose(0, 2, 1, 3)
    k = (xkv @ w[1] + b[1]).reshape(B, S, n_heads, dk).transpose(0, 2, 1, 3)
    v = (xkv @ w[2] + b[2]).reshape(B, S, n_heads, dk).transpose(0, 2, 1, 3)
    scores = jnp.einsum("bhtd,bhsd->bhts", q, k) / jnp.sqrt(jnp.float32(dk))
    scores = jnp.where(mask[:, None, :, :] == 0, -1e9, scores)
    p = jax.nn.softmax(scores, axis=-1)
    o = jnp.einsum("bhts,bhsd->bhtd", p, v).transpose(0, 2, 1, 3).reshape(B, T, D)
    return o @ w[3] + b[3]


def decoder_layer_ref(x, memory, tgt_mask, src_mask, p, *, n_heads):
    """Faithful f32 reference of the PyTorch module (dropout = identity)."""
    sa = _ref_mha(x, x, p["attn_w"][0], p["attn_b"][0], tgt_mask, n_heads)
    x = _ref_layernorm(x + sa, p["ln_g"][0], p["ln_b"][0])
    ca = _ref_mha(x, memory, p["attn_w"][1], p["attn_b"][1], src_mask, n_heads)
    x = _ref_layernorm(x + ca, p["ln_g"][1], p["ln_b"][1])
    ff = jnp.maximum(x @ p["w1"] + p["b1"], 0.0) @ p["w2"] + p["b2"]
    return _ref_layernorm(x + ff, p["ln_g"][2], p["ln_b"][2])


# --------------------------------------- main ---------------------------------------

if __name__ == "__main__":
    B, T, S, D, H, DFF, TQ = 2, 32, 16, 128, 4, 256, 16

    key = jax.random.PRNGKey(0)
    ks = jax.random.split(key, 8)

    x = jax.random.normal(ks[0], (B, T, D), jnp.float32)
    memory = jax.random.normal(ks[1], (B, S, D), jnp.float32)

    # tgt_mask: causal; src_mask: all visible (float {0,1}).
    tgt_mask = jnp.broadcast_to(jnp.tril(jnp.ones((T, T), jnp.float32)), (B, T, T))
    src_mask = jnp.ones((B, T, S), jnp.float32)

    params = {
        # [self/src][q,k,v,out] projection weights, stored as (in, out) = W_torch.T
        "attn_w": 0.05 * jax.random.normal(ks[2], (2, 4, D, D), jnp.float32),
        "attn_b": 0.05 * jax.random.normal(ks[3], (2, 4, 1, D), jnp.float32),
        "w1": 0.05 * jax.random.normal(ks[4], (D, DFF), jnp.float32),
        "b1": 0.05 * jax.random.normal(ks[5], (1, DFF), jnp.float32),
        "w2": 0.05 * jax.random.normal(ks[6], (DFF, D), jnp.float32),
        "b2": 0.05 * jax.random.normal(ks[7], (1, D), jnp.float32),
        # LayerNorm params as in the module __init__: a_2 = ones, b_2 = zeros
        "ln_g": jnp.ones((3, 1, D), jnp.float32),
        "ln_b": jnp.zeros((3, 1, D), jnp.float32),
    }

    # Demo uses the optimized path (in-kernel causal mask, src mask skipped), which is
    # semantically identical to streaming these particular masks.
    out = decoder_layer(x, memory, tgt_mask, src_mask, params, n_heads=H,
                        q_tile=TQ, causal_tgt=True, full_src=True)
    out = jax.block_until_ready(out)
    assert out.shape == (B, T, D)

    # Check against the faithful f32 reference; tolerance covers bf16 MXU operands,
    # the bf16 boundary cast of x, and the approximate softmax reciprocal.
    ref = decoder_layer_ref(x, memory, tgt_mask, src_mask, params, n_heads=H)
    assert jnp.allclose(out, ref, atol=7.5e-2, rtol=7.5e-2), "kernel/f32-reference mismatch"

    print("KERNEL_OK")
</pallas_src>

<mosaic_0001>
module attributes {stable_mosaic.version = 11 : i64} {
  func.func @kernel(%arg0: i32, %arg1: i32, %arg2: memref<1x16x128xbf16, #tpu.memory_space<vmem>>, %arg3: memref<1x4x32x32xbf16, #tpu.memory_space<vmem>>, %arg4: memref<1x4x32x32xbf16, #tpu.memory_space<vmem>>, %arg5: memref<1x4x16x32xbf16, #tpu.memory_space<vmem>>, %arg6: memref<1x4x16x32xbf16, #tpu.memory_space<vmem>>, %arg7: memref<2x128x128xbf16, #tpu.memory_space<vmem>>, %arg8: memref<2x1x128xf32, #tpu.memory_space<vmem>>, %arg9: memref<2x128x128xbf16, #tpu.memory_space<vmem>>, %arg10: memref<2x1x128xf32, #tpu.memory_space<vmem>>, %arg11: memref<128x256xbf16, #tpu.memory_space<vmem>>, %arg12: memref<1x256xf32, #tpu.memory_space<vmem>>, %arg13: memref<256x128xbf16, #tpu.memory_space<vmem>>, %arg14: memref<1x128xf32, #tpu.memory_space<vmem>>, %arg15: memref<3x1x128xf32, #tpu.memory_space<vmem>>, %arg16: memref<3x1x128xf32, #tpu.memory_space<vmem>>, %arg17: memref<1x16x128xf32, #tpu.memory_space<vmem>>) attributes {dimension_semantics = [#tpu.dimension_semantics<parallel>, #tpu.dimension_semantics<parallel>], iteration_bounds = array<i64: 2, 2>, scalar_prefetch = 0 : i64, scratch_operands = 0 : i64, tpu.core_type = #tpu.core_type<tc>, window_params = [{transform_indices = @transform_0, window_bounds = array<i64: 1, 16, 128>}, {transform_indices = @transform_1, window_bounds = array<i64: 1, 4, 32, 32>}, {transform_indices = @transform_2, window_bounds = array<i64: 1, 4, 32, 32>}, {transform_indices = @transform_3, window_bounds = array<i64: 1, 4, 16, 32>}, {transform_indices = @transform_4, window_bounds = array<i64: 1, 4, 16, 32>}, {pipeline_mode = #tpu.pipeline_mode<synchronous>, transform_indices = @transform_5, window_bounds = array<i64: 2, 128, 128>}, {pipeline_mode = #tpu.pipeline_mode<synchronous>, transform_indices = @transform_6, window_bounds = array<i64: 2, 1, 128>}, {pipeline_mode = #tpu.pipeline_mode<synchronous>, transform_indices = @transform_7, window_bounds = array<i64: 2, 128, 128>}, {pipeline_mode = #tpu.pipeline_mode<synchronous>, transform_indices = @transform_8, window_bounds = array<i64: 2, 1, 128>}, {pipeline_mode = #tpu.pipeline_mode<synchronous>, transform_indices = @transform_9, window_bounds = array<i64: 128, 256>}, {pipeline_mode = #tpu.pipeline_mode<synchronous>, transform_indices = @transform_10, window_bounds = array<i64: 1, 256>}, {pipeline_mode = #tpu.pipeline_mode<synchronous>, transform_indices = @transform_11, window_bounds = array<i64: 256, 128>}, {pipeline_mode = #tpu.pipeline_mode<synchronous>, transform_indices = @transform_12, window_bounds = array<i64: 1, 128>}, {pipeline_mode = #tpu.pipeline_mode<synchronous>, transform_indices = @transform_13, window_bounds = array<i64: 3, 1, 128>}, {pipeline_mode = #tpu.pipeline_mode<synchronous>, transform_indices = @transform_14, window_bounds = array<i64: 3, 1, 128>}, {transform_indices = @transform_15, window_bounds = array<i64: 1, 16, 128>}]} {
    %c0 = arith.constant 0 : index
    %c0_0 = arith.constant 0 : index
    %c0_1 = arith.constant 0 : index
    %0 = vector.load %arg2[%c0, %c0_0, %c0_1] : memref<1x16x128xbf16, #tpu.memory_space<vmem>>, vector<1x16x128xbf16>
    %1 = vector.shape_cast %0 : vector<1x16x128xbf16> to vector<16x128xbf16>
    %2 = arith.extf %1 : vector<16x128xbf16> to vector<16x128xf32>
    %3 = tpu.iota {dimensions = array<i32: 0>} : vector<16x32xi32>
    %c16_i32 = arith.constant 16 : i32
    %4 = arith.muli %arg1, %c16_i32 : i32
    %5 = vector.broadcast %4 : i32 to vector<16x32xi32>
    %6 = arith.addi %3, %5 : vector<16x32xi32>
    %7 = tpu.iota {dimensions = array<i32: 1>} : vector<16x32xi32>
    %8 = arith.cmpi sle, %7, %6 : vector<16x32xi32>
    %cst = arith.constant 0.000000e+00 : f32
    %cst_2 = arith.constant -1.000000e+09 : f32
    %9 = vector.broadcast %cst : f32 to vector<16x32xf32>
    %10 = vector.broadcast %cst_2 : f32 to vector<16x32xf32>
    %11 = arith.select %8, %9, %10 : vector<16x32xi1>, vector<16x32xf32>
    %c0_3 = arith.constant 0 : index
    %c0_4 = arith.constant 0 : index
    %c0_5 = arith.constant 0 : index
    %c0_6 = arith.constant 0 : index
    %12 = vector.load %arg3[%c0_3, %c0_4, %c0_5, %c0_6] : memref<1x4x32x32xbf16, #tpu.memory_space<vmem>>, vector<1x4x32x32xbf16>
    %13 = vector.shape_cast %12 : vector<1x4x32x32xbf16> to vector<4x32x32xbf16>
    %c0_7 = arith.constant 0 : index
    %c0_8 = arith.constant 0 : index
    %c0_9 = arith.constant 0 : index
    %c0_10 = arith.constant 0 : index
    %14 = vector.load %arg4[%c0_7, %c0_8, %c0_9, %c0_10] : memref<1x4x32x32xbf16, #tpu.memory_space<vmem>>, vector<1x4x32x32xbf16>
    %15 = vector.shape_cast %14 : vector<1x4x32x32xbf16> to vector<4x32x32xbf16>
    %c0_11 = arith.constant 0 : index
    %c0_12 = arith.constant 0 : index
    %c0_13 = arith.constant 0 : index
    %16 = vector.load %arg7[%c0_11, %c0_12, %c0_13] : memref<2x128x128xbf16, #tpu.memory_space<vmem>>, vector<1x128x128xbf16>
    %17 = vector.shape_cast %16 : vector<1x128x128xbf16> to vector<128x128xbf16>
    %c0_14 = arith.constant 0 : index
    %c0_15 = arith.constant 0 : index
    %c0_16 = arith.constant 0 : index
    %18 = vector.load %arg8[%c0_14, %c0_15, %c0_16] : memref<2x1x128xf32, #tpu.memory_space<vmem>>, vector<1x1x128xf32>
    %19 = vector.shape_cast %18 : vector<1x1x128xf32> to vector<1x128xf32>
    %c0_17 = arith.constant 0 : index
    %c0_18 = arith.constant 0 : index
    %c0_19 = arith.constant 0 : index
    %20 = vector.load %arg9[%c0_17, %c0_18, %c0_19] : memref<2x128x128xbf16, #tpu.memory_space<vmem>>, vector<1x128x128xbf16>
    %21 = vector.shape_cast %20 : vector<1x128x128xbf16> to vector<128x128xbf16>
    %c0_20 = arith.constant 0 : index
    %c0_21 = arith.constant 0 : index
    %c0_22 = arith.constant 0 : index
    %22 = vector.load %arg10[%c0_20, %c0_21, %c0_22] : memref<2x1x128xf32, #tpu.memory_space<vmem>>, vector<1x1x128xf32>
    %23 = vector.shape_cast %22 : vector<1x1x128xf32> to vector<1x128xf32>
    %cst_23 = arith.constant dense<0.000000e+00> : vector<16x128xf32>
    %24 = tpu.matmul %1, %17, %cst_23 {dimension_numbers = #tpu.dot_dimension_numbers<[1], [0], [0], [1], [0, 0, 1, 1], [], []>} : vector<16x128xbf16>, vector<128x128xbf16>, vector<16x128xf32> -> vector<16x128xf32>
    %25 = vector.broadcast %19 : vector<1x128xf32> to vector<16x128xf32>
    %26 = arith.addf %24, %25 : vector<16x128xf32>
    %27 = vector.shape_cast %26 : vector<16x128xf32> to vector<16x4x32xf32>
    %28 = tpu.transpose %27, [1, 0, 2] : vector<16x4x32xf32> -> vector<4x16x32xf32>
    %29 = arith.truncf %28 : vector<4x16x32xf32> to vector<4x16x32xbf16>
    "tpu.trace_start"() <{level = 10 : i32, message = "hqk,hsk->hqs"}> : () -> ()
    %cst_24 = arith.constant dense<0.000000e+00> : vector<4x16x32xf32>
    %30 = tpu.matmul %29, %13, %cst_24 {dimension_numbers = #tpu.dot_dimension_numbers<[2], [2], [1], [1], [0, 0, 0, 1, 1, 1], [0], [0]>} : vector<4x16x32xbf16>, vector<4x32x32xbf16>, vector<4x16x32xf32> -> vector<4x16x32xf32>
    "tpu.trace_stop"() : () -> ()
    %31 = vector.shape_cast %11 : vector<16x32xf32> to vector<1x16x32xf32>
    %32 = vector.broadcast %31 : vector<1x16x32xf32> to vector<4x16x32xf32>
    %33 = arith.addf %30, %32 : vector<4x16x32xf32>
    %cst_25 = arith.constant dense<0xFF800000> : vector<4x16xf32>
    %34 = vector.multi_reduction <maximumf>, %33, %cst_25 [2] : vector<4x16x32xf32> to vector<4x16xf32>
    %35 = vector.shape_cast %34 : vector<4x16xf32> to vector<4x16x1xf32>
    %36 = vector.broadcast %35 : vector<4x16x1xf32> to vector<4x16x32xf32>
    %37 = arith.subf %33, %36 : vector<4x16x32xf32>
    %38 = math.exp %37 : vector<4x16x32xf32>
    %cst_26 = arith.constant dense<0.000000e+00> : vector<4x16xf32>
    %39 = vector.multi_reduction <add>, %38, %cst_26 [2] : vector<4x16x32xf32> to vector<4x16xf32>
    %40 = vector.shape_cast %39 : vector<4x16xf32> to vector<4x16x1xf32>
    %41 = tpu.reciprocal %40 {approx = true} : vector<4x16x1xf32> -> vector<4x16x1xf32>
    %42 = vector.broadcast %41 : vector<4x16x1xf32> to vector<4x16x32xf32>
    %43 = arith.mulf %38, %42 : vector<4x16x32xf32>
    %44 = arith.truncf %43 : vector<4x16x32xf32> to vector<4x16x32xbf16>
    "tpu.trace_start"() <{level = 10 : i32, message = "hqs,hsk->hqk"}> : () -> ()
    %cst_27 = arith.constant dense<0.000000e+00> : vector<4x16x32xf32>
    %45 = tpu.matmul %44, %15, %cst_27 {dimension_numbers = #tpu.dot_dimension_numbers<[2], [1], [1], [2], [0, 0, 0, 1, 1, 2], [0], [0]>} : vector<4x16x32xbf16>, vector<4x32x32xbf16>, vector<4x16x32xf32> -> vector<4x16x32xf32>
    "tpu.trace_stop"() : () -> ()
    %46 = tpu.transpose %45, [1, 0, 2] : vector<4x16x32xf32> -> vector<16x4x32xf32>
    %47 = vector.shape_cast %46 : vector<16x4x32xf32> to vector<16x128xf32>
    %48 = arith.truncf %47 : vector<16x128xf32> to vector<16x128xbf16>
    %cst_28 = arith.constant dense<0.000000e+00> : vector<16x128xf32>
    %49 = tpu.matmul %48, %21, %cst_28 {dimension_numbers = #tpu.dot_dimension_numbers<[1], [0], [0], [1], [0, 0, 1, 1], [], []>} : vector<16x128xbf16>, vector<128x128xbf16>, vector<16x128xf32> -> vector<16x128xf32>
    %50 = vector.broadcast %23 : vector<1x128xf32> to vector<16x128xf32>
    %51 = arith.addf %49, %50 : vector<16x128xf32>
    %52 = arith.addf %2, %51 : vector<16x128xf32>
    %c0_29 = arith.constant 0 : index
    %c0_30 = arith.constant 0 : index
    %c0_31 = arith.constant 0 : index
    %53 = vector.load %arg15[%c0_29, %c0_30, %c0_31] : memref<3x1x128xf32, #tpu.memory_space<vmem>>, vector<1x1x128xf32>
    %54 = vector.shape_cast %53 : vector<1x1x128xf32> to vector<1x128xf32>
    %c0_32 = arith.constant 0 : index
    %c0_33 = arith.constant 0 : index
    %c0_34 = arith.constant 0 : index
    %55 = vector.load %arg16[%c0_32, %c0_33, %c0_34] : memref<3x1x128xf32, #tpu.memory_space<vmem>>, vector<1x1x128xf32>
    %56 = vector.shape_cast %55 : vector<1x1x128xf32> to vector<1x128xf32>
    %cst_35 = arith.constant dense<0.000000e+00> : vector<16xf32>
    %57 = vector.multi_reduction <add>, %52, %cst_35 [1] : vector<16x128xf32> to vector<16xf32>
    %58 = vector.shape_cast %57 : vector<16xf32> to vector<16x1xf32>
    %cst_36 = arith.constant 1.280000e+02 : f32
    %59 = vector.broadcast %cst_36 : f32 to vector<16x1xf32>
    %60 = arith.divf %58, %59 : vector<16x1xf32>
    %61 = vector.broadcast %60 : vector<16x1xf32> to vector<16x128xf32>
    %62 = arith.subf %52, %61 : vector<16x128xf32>
    %63 = arith.mulf %62, %62 : vector<16x128xf32>
    %cst_37 = arith.constant dense<0.000000e+00> : vector<16xf32>
    %64 = vector.multi_reduction <add>, %63, %cst_37 [1] : vector<16x128xf32> to vector<16xf32>
    %65 = vector.shape_cast %64 : vector<16xf32> to vector<16x1xf32>
    %cst_38 = arith.constant 1.270000e+02 : f32
    %66 = vector.broadcast %cst_38 : f32 to vector<16x1xf32>
    %67 = arith.divf %65, %66 : vector<16x1xf32>
    %68 = vector.broadcast %60 : vector<16x1xf32> to vector<16x128xf32>
    %69 = arith.subf %52, %68 : vector<16x128xf32>
    %70 = vector.broadcast %54 : vector<1x128xf32> to vector<16x128xf32>
    %71 = arith.mulf %70, %69 : vector<16x128xf32>
    %72 = math.sqrt %67 : vector<16x1xf32>
    %cst_39 = arith.constant 9.99999997E-7 : f32
    %73 = vector.broadcast %cst_39 : f32 to vector<16x1xf32>
    %74 = arith.addf %72, %73 : vector<16x1xf32>
    %75 = vector.broadcast %74 : vector<16x1xf32> to vector<16x128xf32>
    %76 = arith.divf %71, %75 : vector<16x128xf32>
    %77 = vector.broadcast %56 : vector<1x128xf32> to vector<16x128xf32>
    %78 = arith.addf %76, %77 : vector<16x128xf32>
    %79 = arith.truncf %78 : vector<16x128xf32> to vector<16x128xbf16>
    %c0_40 = arith.constant 0 : index
    %c0_41 = arith.constant 0 : index
    %c0_42 = arith.constant 0 : index
    %c0_43 = arith.constant 0 : index
    %80 = vector.load %arg5[%c0_40, %c0_41, %c0_42, %c0_43] : memref<1x4x16x32xbf16, #tpu.memory_space<vmem>>, vector<1x4x16x32xbf16>
    %81 = vector.shape_cast %80 : vector<1x4x16x32xbf16> to vector<4x16x32xbf16>
    %c0_44 = arith.constant 0 : index
    %c0_45 = arith.constant 0 : index
    %c0_46 = arith.constant 0 : index
    %c0_47 = arith.constant 0 : index
    %82 = vector.load %arg6[%c0_44, %c0_45, %c0_46, %c0_47] : memref<1x4x16x32xbf16, #tpu.memory_space<vmem>>, vector<1x4x16x32xbf16>
    %83 = vector.shape_cast %82 : vector<1x4x16x32xbf16> to vector<4x16x32xbf16>
    %c1 = arith.constant 1 : index
    %c0_48 = arith.constant 0 : index
    %c0_49 = arith.constant 0 : index
    %84 = vector.load %arg7[%c1, %c0_48, %c0_49] : memref<2x128x128xbf16, #tpu.memory_space<vmem>>, vector<1x128x128xbf16>
    %85 = vector.shape_cast %84 : vector<1x128x128xbf16> to vector<128x128xbf16>
    %c1_50 = arith.constant 1 : index
    %c0_51 = arith.constant 0 : index
    %c0_52 = arith.constant 0 : index
    %86 = vector.load %arg8[%c1_50, %c0_51, %c0_52] : memref<2x1x128xf32, #tpu.memory_space<vmem>>, vector<1x1x128xf32>
    %87 = vector.shape_cast %86 : vector<1x1x128xf32> to vector<1x128xf32>
    %c1_53 = arith.constant 1 : index
    %c0_54 = arith.constant 0 : index
    %c0_55 = arith.constant 0 : index
    %88 = vector.load %arg9[%c1_53, %c0_54, %c0_55] : memref<2x128x128xbf16, #tpu.memory_space<vmem>>, vector<1x128x128xbf16>
    %89 = vector.shape_cast %88 : vector<1x128x128xbf16> to vector<128x128xbf16>
    %c1_56 = arith.constant 1 : index
    %c0_57 = arith.constant 0 : index
    %c0_58 = arith.constant 0 : index
    %90 = vector.load %arg10[%c1_56, %c0_57, %c0_58] : memref<2x1x128xf32, #tpu.memory_space<vmem>>, vector<1x1x128xf32>
    %91 = vector.shape_cast %90 : vector<1x1x128xf32> to vector<1x128xf32>
    %cst_59 = arith.constant dense<0.000000e+00> : vector<16x128xf32>
    %92 = tpu.matmul %79, %85, %cst_59 {dimension_numbers = #tpu.dot_dimension_numbers<[1], [0], [0], [1], [0, 0, 1, 1], [], []>} : vector<16x128xbf16>, vector<128x128xbf16>, vector<16x128xf32> -> vector<16x128xf32>
    %93 = vector.broadcast %87 : vector<1x128xf32> to vector<16x128xf32>
    %94 = arith.addf %92, %93 : vector<16x128xf32>
    %95 = vector.shape_cast %94 : vector<16x128xf32> to vector<16x4x32xf32>
    %96 = tpu.transpose %95, [1, 0, 2] : vector<16x4x32xf32> -> vector<4x16x32xf32>
    %97 = arith.truncf %96 : vector<4x16x32xf32> to vector<4x16x32xbf16>
    "tpu.trace_start"() <{level = 10 : i32, message = "hqk,hsk->hqs"}> : () -> ()
    %cst_60 = arith.constant dense<0.000000e+00> : vector<4x16x16xf32>
    %98 = tpu.matmul %97, %81, %cst_60 {dimension_numbers = #tpu.dot_dimension_numbers<[2], [2], [1], [1], [0, 0, 0, 1, 1, 1], [0], [0]>} : vector<4x16x32xbf16>, vector<4x16x32xbf16>, vector<4x16x16xf32> -> vector<4x16x16xf32>
    "tpu.trace_stop"() : () -> ()
    %cst_61 = arith.constant dense<0xFF800000> : vector<4x16xf32>
    %99 = vector.multi_reduction <maximumf>, %98, %cst_61 [2] : vector<4x16x16xf32> to vector<4x16xf32>
    %100 = vector.shape_cast %99 : vector<4x16xf32> to vector<4x16x1xf32>
    %101 = vector.broadcast %100 : vector<4x16x1xf32> to vector<4x16x16xf32>
    %102 = arith.subf %98, %101 : vector<4x16x16xf32>
    %103 = math.exp %102 : vector<4x16x16xf32>
    %cst_62 = arith.constant dense<0.000000e+00> : vector<4x16xf32>
    %104 = vector.multi_reduction <add>, %103, %cst_62 [2] : vector<4x16x16xf32> to vector<4x16xf32>
    %105 = vector.shape_cast %104 : vector<4x16xf32> to vector<4x16x1xf32>
    %106 = tpu.reciprocal %105 {approx = true} : vector<4x16x1xf32> -> vector<4x16x1xf32>
    %107 = vector.broadcast %106 : vector<4x16x1xf32> to vector<4x16x16xf32>
    %108 = arith.mulf %103, %107 : vector<4x16x16xf32>
    %109 = arith.truncf %108 : vector<4x16x16xf32> to vector<4x16x16xbf16>
    "tpu.trace_start"() <{level = 10 : i32, message = "hqs,hsk->hqk"}> : () -> ()
    %cst_63 = arith.constant dense<0.000000e+00> : vector<4x16x32xf32>
    %110 = tpu.matmul %109, %83, %cst_63 {dimension_numbers = #tpu.dot_dimension_numbers<[2], [1], [1], [2], [0, 0, 0, 1, 1, 2], [0], [0]>} : vector<4x16x16xbf16>, vector<4x16x32xbf16>, vector<4x16x32xf32> -> vector<4x16x32xf32>
    "tpu.trace_stop"() : () -> ()
    %111 = tpu.transpose %110, [1, 0, 2] : vector<4x16x32xf32> -> vector<16x4x32xf32>
    %112 = vector.shape_cast %111 : vector<16x4x32xf32> to vector<16x128xf32>
    %113 = arith.truncf %112 : vector<16x128xf32> to vector<16x128xbf16>
    %cst_64 = arith.constant dense<0.000000e+00> : vector<16x128xf32>
    %114 = tpu.matmul %113, %89, %cst_64 {dimension_numbers = #tpu.dot_dimension_numbers<[1], [0], [0], [1], [0, 0, 1, 1], [], []>} : vector<16x128xbf16>, vector<128x128xbf16>, vector<16x128xf32> -> vector<16x128xf32>
    %115 = vector.broadcast %91 : vector<1x128xf32> to vector<16x128xf32>
    %116 = arith.addf %114, %115 : vector<16x128xf32>
    %117 = arith.addf %78, %116 : vector<16x128xf32>
    %c1_65 = arith.constant 1 : index
    %c0_66 = arith.constant 0 : index
    %c0_67 = arith.constant 0 : index
    %118 = vector.load %arg15[%c1_65, %c0_66, %c0_67] : memref<3x1x128xf32, #tpu.memory_space<vmem>>, vector<1x1x128xf32>
    %119 = vector.shape_cast %118 : vector<1x1x128xf32> to vector<1x128xf32>
    %c1_68 = arith.constant 1 : index
    %c0_69 = arith.constant 0 : index
    %c0_70 = arith.constant 0 : index
    %120 = vector.load %arg16[%c1_68, %c0_69, %c0_70] : memref<3x1x128xf32, #tpu.memory_space<vmem>>, vector<1x1x128xf32>
    %121 = vector.shape_cast %120 : vector<1x1x128xf32> to vector<1x128xf32>
    %cst_71 = arith.constant dense<0.000000e+00> : vector<16xf32>
    %122 = vector.multi_reduction <add>, %117, %cst_71 [1] : vector<16x128xf32> to vector<16xf32>
    %123 = vector.shape_cast %122 : vector<16xf32> to vector<16x1xf32>
    %cst_72 = arith.constant 1.280000e+02 : f32
    %124 = vector.broadcast %cst_72 : f32 to vector<16x1xf32>
    %125 = arith.divf %123, %124 : vector<16x1xf32>
    %126 = vector.broadcast %125 : vector<16x1xf32> to vector<16x128xf32>
    %127 = arith.subf %117, %126 : vector<16x128xf32>
    %128 = arith.mulf %127, %127 : vector<16x128xf32>
    %cst_73 = arith.constant dense<0.000000e+00> : vector<16xf32>
    %129 = vector.multi_reduction <add>, %128, %cst_73 [1] : vector<16x128xf32> to vector<16xf32>
    %130 = vector.shape_cast %129 : vector<16xf32> to vector<16x1xf32>
    %cst_74 = arith.constant 1.270000e+02 : f32
    %131 = vector.broadcast %cst_74 : f32 to vector<16x1xf32>
    %132 = arith.divf %130, %131 : vector<16x1xf32>
    %133 = vector.broadcast %125 : vector<16x1xf32> to vector<16x128xf32>
    %134 = arith.subf %117, %133 : vector<16x128xf32>
    %135 = vector.broadcast %119 : vector<1x128xf32> to vector<16x128xf32>
    %136 = arith.mulf %135, %134 : vector<16x128xf32>
    %137 = math.sqrt %132 : vector<16x1xf32>
    %cst_75 = arith.constant 9.99999997E-7 : f32
    %138 = vector.broadcast %cst_75 : f32 to vector<16x1xf32>
    %139 = arith.addf %137, %138 : vector<16x1xf32>
    %140 = vector.broadcast %139 : vector<16x1xf32> to vector<16x128xf32>
    %141 = arith.divf %136, %140 : vector<16x128xf32>
    %142 = vector.broadcast %121 : vector<1x128xf32> to vector<16x128xf32>
    %143 = arith.addf %141, %142 : vector<16x128xf32>
    %144 = arith.truncf %143 : vector<16x128xf32> to vector<16x128xbf16>
    %c0_76 = arith.constant 0 : index
    %c0_77 = arith.constant 0 : index
    %145 = vector.load %arg11[%c0_76, %c0_77] : memref<128x256xbf16, #tpu.memory_space<vmem>>, vector<128x256xbf16>
    %cst_78 = arith.constant dense<0.000000e+00> : vector<16x256xf32>
    %146 = tpu.matmul %144, %145, %cst_78 {dimension_numbers = #tpu.dot_dimension_numbers<[1], [0], [0], [1], [0, 0, 1, 1], [], []>} : vector<16x128xbf16>, vector<128x256xbf16>, vector<16x256xf32> -> vector<16x256xf32>
    %c0_79 = arith.constant 0 : index
    %c0_80 = arith.constant 0 : index
    %147 = vector.load %arg12[%c0_79, %c0_80] : memref<1x256xf32, #tpu.memory_space<vmem>>, vector<1x256xf32>
    %148 = vector.broadcast %147 : vector<1x256xf32> to vector<16x256xf32>
    %149 = arith.addf %146, %148 : vector<16x256xf32>
    %cst_81 = arith.constant 0.000000e+00 : f32
    %150 = vector.broadcast %cst_81 : f32 to vector<16x256xf32>
    %151 = arith.maximumf %149, %150 : vector<16x256xf32>
    %152 = arith.truncf %151 : vector<16x256xf32> to vector<16x256xbf16>
    %c0_82 = arith.constant 0 : index
    %c0_83 = arith.constant 0 : index
    %153 = vector.load %arg13[%c0_82, %c0_83] : memref<256x128xbf16, #tpu.memory_space<vmem>>, vector<256x128xbf16>
    %cst_84 = arith.constant dense<0.000000e+00> : vector<16x128xf32>
    %154 = tpu.matmul %152, %153, %cst_84 {dimension_numbers = #tpu.dot_dimension_numbers<[1], [0], [0], [1], [0, 0, 1, 1], [], []>} : vector<16x256xbf16>, vector<256x128xbf16>, vector<16x128xf32> -> vector<16x128xf32>
    %c0_85 = arith.constant 0 : index
    %c0_86 = arith.constant 0 : index
    %155 = vector.load %arg14[%c0_85, %c0_86] : memref<1x128xf32, #tpu.memory_space<vmem>>, vector<1x128xf32>
    %156 = vector.broadcast %155 : vector<1x128xf32> to vector<16x128xf32>
    %157 = arith.addf %154, %156 : vector<16x128xf32>
    %158 = arith.addf %143, %157 : vector<16x128xf32>
    %c2 = arith.constant 2 : index
    %c0_87 = arith.constant 0 : index
    %c0_88 = arith.constant 0 : index
    %159 = vector.load %arg15[%c2, %c0_87, %c0_88] : memref<3x1x128xf32, #tpu.memory_space<vmem>>, vector<1x1x128xf32>
    %160 = vector.shape_cast %159 : vector<1x1x128xf32> to vector<1x128xf32>
    %c2_89 = arith.constant 2 : index
    %c0_90 = arith.constant 0 : index
    %c0_91 = arith.constant 0 : index
    %161 = vector.load %arg16[%c2_89, %c0_90, %c0_91] : memref<3x1x128xf32, #tpu.memory_space<vmem>>, vector<1x1x128xf32>
    %162 = vector.shape_cast %161 : vector<1x1x128xf32> to vector<1x128xf32>
    %cst_92 = arith.constant dense<0.000000e+00> : vector<16xf32>
    %163 = vector.multi_reduction <add>, %158, %cst_92 [1] : vector<16x128xf32> to vector<16xf32>
    %164 = vector.shape_cast %163 : vector<16xf32> to vector<16x1xf32>
    %cst_93 = arith.constant 1.280000e+02 : f32
    %165 = vector.broadcast %cst_93 : f32 to vector<16x1xf32>
    %166 = arith.divf %164, %165 : vector<16x1xf32>
    %167 = vector.broadcast %166 : vector<16x1xf32> to vector<16x128xf32>
    %168 = arith.subf %158, %167 : vector<16x128xf32>
    %169 = arith.mulf %168, %168 : vector<16x128xf32>
    %cst_94 = arith.constant dense<0.000000e+00> : vector<16xf32>
    %170 = vector.multi_reduction <add>, %169, %cst_94 [1] : vector<16x128xf32> to vector<16xf32>
    %171 = vector.shape_cast %170 : vector<16xf32> to vector<16x1xf32>
    %cst_95 = arith.constant 1.270000e+02 : f32
    %172 = vector.broadcast %cst_95 : f32 to vector<16x1xf32>
    %173 = arith.divf %171, %172 : vector<16x1xf32>
    %174 = vector.broadcast %166 : vector<16x1xf32> to vector<16x128xf32>
    %175 = arith.subf %158, %174 : vector<16x128xf32>
    %176 = vector.broadcast %160 : vector<1x128xf32> to vector<16x128xf32>
    %177 = arith.mulf %176, %175 : vector<16x128xf32>
    %178 = math.sqrt %173 : vector<16x1xf32>
    %cst_96 = arith.constant 9.99999997E-7 : f32
    %179 = vector.broadcast %cst_96 : f32 to vector<16x1xf32>
    %180 = arith.addf %178, %179 : vector<16x1xf32>
    %181 = vector.broadcast %180 : vector<16x1xf32> to vector<16x128xf32>
    %182 = arith.divf %177, %181 : vector<16x128xf32>
    %183 = vector.broadcast %162 : vector<1x128xf32> to vector<16x128xf32>
    %184 = arith.addf %182, %183 : vector<16x128xf32>
    %c0_97 = arith.constant 0 : index
    %c0_98 = arith.constant 0 : index
    %c0_99 = arith.constant 0 : index
    %185 = vector.load %arg17[%c0_97, %c0_98, %c0_99] : memref<1x16x128xf32, #tpu.memory_space<vmem>>, vector<1x16x128xf32>
    %186 = vector.shape_cast %185 : vector<1x16x128xf32> to vector<16x128xf32>
    %187 = vector.shape_cast %184 : vector<16x128xf32> to vector<1x16x128xf32>
    tpu.vector_store %arg17[%c0_97, %c0_98, %c0_99], %187 {strides = array<i32>} : memref<1x16x128xf32, #tpu.memory_space<vmem>>, vector<1x16x128xf32>,
    return
  }
  func.func @transform_0(%arg0: i32, %arg1: i32) -> (i32, i32, i32) {
    %c0_i32 = arith.constant 0 : i32
    %c0_i32_0 = arith.constant 0 : i32
    return %arg0, %arg1, %c0_i32 : i32, i32, i32
  }
  func.func @transform_1(%arg0: i32, %arg1: i32) -> (i32, i32, i32, i32) {
    %c0_i32 = arith.constant 0 : i32
    %c0_i32_0 = arith.constant 0 : i32
    %c0_i32_1 = arith.constant 0 : i32
    %c0_i32_2 = arith.constant 0 : i32
    return %arg0, %c0_i32, %c0_i32_0, %c0_i32_1 : i32, i32, i32, i32
  }
  func.func @transform_2(%arg0: i32, %arg1: i32) -> (i32, i32, i32, i32) {
    %c0_i32 = arith.constant 0 : i32
    %c0_i32_0 = arith.constant 0 : i32
    %c0_i32_1 = arith.constant 0 : i32
    %c0_i32_2 = arith.constant 0 : i32
    return %arg0, %c0_i32, %c0_i32_0, %c0_i32_1 : i32, i32, i32, i32
  }
  func.func @transform_3(%arg0: i32, %arg1: i32) -> (i32, i32, i32, i32) {
    %c0_i32 = arith.constant 0 : i32
    %c0_i32_0 = arith.constant 0 : i32
    %c0_i32_1 = arith.constant 0 : i32
    %c0_i32_2 = arith.constant 0 : i32
    return %arg0, %c0_i32, %c0_i32_0, %c0_i32_1 : i32, i32, i32, i32
  }
  func.func @transform_4(%arg0: i32, %arg1: i32) -> (i32, i32, i32, i32) {
    %c0_i32 = arith.constant 0 : i32
    %c0_i32_0 = arith.constant 0 : i32
    %c0_i32_1 = arith.constant 0 : i32
    %c0_i32_2 = arith.constant 0 : i32
    return %arg0, %c0_i32, %c0_i32_0, %c0_i32_1 : i32, i32, i32, i32
  }
  func.func @transform_5(%arg0: i32, %arg1: i32) -> (i32, i32, i32) {
    %c0_i32 = arith.constant 0 : i32
    %c0_i32_0 = arith.constant 0 : i32
    %c0_i32_1 = arith.constant 0 : i32
    %c0_i32_2 = arith.constant 0 : i32
    return %c0_i32, %c0_i32_0, %c0_i32_1 : i32, i32, i32
  }
  func.func @transform_6(%arg0: i32, %arg1: i32) -> (i32, i32, i32) {
    %c0_i32 = arith.constant 0 : i32
    %c0_i32_0 = arith.constant 0 : i32
    %c0_i32_1 = arith.constant 0 : i32
    %c0_i32_2 = arith.constant 0 : i32
    return %c0_i32, %c0_i32_0, %c0_i32_1 : i32, i32, i32
  }
  func.func @transform_7(%arg0: i32, %arg1: i32) -> (i32, i32, i32) {
    %c0_i32 = arith.constant 0 : i32
    %c0_i32_0 = arith.constant 0 : i32
    %c0_i32_1 = arith.constant 0 : i32
    %c0_i32_2 = arith.constant 0 : i32
    return %c0_i32, %c0_i32_0, %c0_i32_1 : i32, i32, i32
  }
  func.func @transform_8(%arg0: i32, %arg1: i32) -> (i32, i32, i32) {
    %c0_i32 = arith.constant 0 : i32
    %c0_i32_0 = arith.constant 0 : i32
    %c0_i32_1 = arith.constant 0 : i32
    %c0_i32_2 = arith.constant 0 : i32
    return %c0_i32, %c0_i32_0, %c0_i32_1 : i32, i32, i32
  }
  func.func @transform_9(%arg0: i32, %arg1: i32) -> (i32, i32) {
    %c0_i32 = arith.constant 0 : i32
    %c0_i32_0 = arith.constant 0 : i32
    %c0_i32_1 = arith.constant 0 : i32
    return %c0_i32, %c0_i32_0 : i32, i32
  }
  func.func @transform_10(%arg0: i32, %arg1: i32) -> (i32, i32) {
    %c0_i32 = arith.constant 0 : i32
    %c0_i32_0 = arith.constant 0 : i32
    %c0_i32_1 = arith.constant 0 : i32
    return %c0_i32, %c0_i32_0 : i32, i32
  }
  func.func @transform_11(%arg0: i32, %arg1: i32) -> (i32, i32) {
    %c0_i32 = arith.constant 0 : i32
    %c0_i32_0 = arith.constant 0 : i32
    %c0_i32_1 = arith.constant 0 : i32
    return %c0_i32, %c0_i32_0 : i32, i32
  }
  func.func @transform_12(%arg0: i32, %arg1: i32) -> (i32, i32) {
    %c0_i32 = arith.constant 0 : i32
    %c0_i32_0 = arith.constant 0 : i32
    %c0_i32_1 = arith.constant 0 : i32
    return %c0_i32, %c0_i32_0 : i32, i32
  }
  func.func @transform_13(%arg0: i32, %arg1: i32) -> (i32, i32, i32) {
    %c0_i32 = arith.constant 0 : i32
    %c0_i32_0 = arith.constant 0 : i32
    %c0_i32_1 = arith.constant 0 : i32
    %c0_i32_2 = arith.constant 0 : i32
    return %c0_i32, %c0_i32_0, %c0_i32_1 : i32, i32, i32
  }
  func.func @transform_14(%arg0: i32, %arg1: i32) -> (i32, i32, i32) {
    %c0_i32 = arith.constant 0 : i32
    %c0_i32_0 = arith.constant 0 : i32
    %c0_i32_1 = arith.constant 0 : i32
    %c0_i32_2 = arith.constant 0 : i32
    return %c0_i32, %c0_i32_0, %c0_i32_1 : i32, i32, i32
  }
  func.func @transform_15(%arg0: i32, %arg1: i32) -> (i32, i32, i32) {
    %c0_i32 = arith.constant 0 : i32
    %c0_i32_0 = arith.constant 0 : i32
    return %arg0, %arg1, %c0_i32 : i32, i32, i32
  }
}

</mosaic_0001>

<bundles_post_ra>
// kernel: tpu_custom_call.1
= control target key start
LH: loop header
LB: loop body
LE: loop exit
PB: predicated region body
PF: predicated region fallthrough
CT: control target
= control target key end

     0   :  { %s6457_s0 = inlined_call_operand.hbm [shape: bf16[2,32,128], index: 0, kind: input, shape index: {}]   ;;  %s6458_s1 = inlined_call_operand.hbm [shape: bf16[2,4,32,32], index: 1, kind: input, shape index: {}]   ;;  %s6459_s2 = inlined_call_operand.hbm [shape: bf16[2,4,32,32], index: 2, kind: input, shape index: {}]   ;;  %s6460_s3 = inlined_call_operand.hbm [shape: bf16[2,4,16,32], index: 3, kind: input, shape index: {}]   ;;  %s6461_s4 = inlined_call_operand.hbm [shape: bf16[2,4,16,32], index: 4, kind: input, shape index: {}]   ;;  %s6462_s5 = inlined_call_operand.hbm [shape: bf16[2,128,128], index: 5, kind: input, shape index: {}]   ;;  %s6463_s6 = inlined_call_operand.vmem [shape: f32[2,1,128], index: 6, kind: input, shape index: {}]   ;;  %s6464_s7 = inlined_call_operand.hbm [shape: bf16[2,128,128], index: 7, kind: input, shape index: {}]   ;;  %s6465_s8 = inlined_call_operand.vmem [shape: f32[2,1,128], index: 8, kind: input, shape index: {}]   ;;  %s6466_s9 = inlined_call_operand.hbm [shape: bf16[128,256], index: 9, kind: input, shape index: {}]   ;;  %s6467_s10 = inlined_call_operand.vmem [shape: f32[1,256], index: 10, kind: input, shape index: {}]   ;;  %s6468_s11 = inlined_call_operand.hbm [shape: bf16[256,128], index: 11, kind: input, shape index: {}]   ;;  %s6469_s12 = inlined_call_operand.vmem [shape: f32[1,128], index: 12, kind: input, shape index: {}]   ;;  %s6470_s13 = inlined_call_operand.vmem [shape: f32[3,1,128], index: 13, kind: input, shape index: {}]   ;;  %s6471_s14 = inlined_call_operand.vmem [shape: f32[3,1,128], index: 14, kind: input, shape index: {}]   ;;  %s6472_s15 = inlined_call_operand.hbm [shape: f32[2,32,128], index: 15, kind: output, shape index: {}]  }
   0x1   :  { %6504 = sst [smem:[#allocation38_spill]] %s6457_s0 }
   0x2   :  { %6505 = sst [smem:[#allocation39_spill]] %s6458_s1 }
   0x3   :  { %6506 = sst [smem:[#allocation40_spill]] %s6459_s2 }
   0x4   :  { %6507 = sst [smem:[#allocation41_spill]] %s6460_s3 }
   0x5   :  { %6508 = sst [smem:[#allocation42_spill]] %s6461_s4 }
   0x6   :  { %6509 = sst [smem:[#allocation43_spill]] %s6462_s5 }
   0x7   :  { %6510 = sst [smem:[#allocation44_spill]] %s6463_s6 }
   0x8   :  { %6511 = sst [smem:[#allocation45_spill]] %s6464_s7 }
   0x9   :  { %6512 = sst [smem:[#allocation46_spill]] %s6465_s8 }
   0xa   :  { %6513 = sst [smem:[#allocation47_spill]] %s6466_s9 }
   0xb   :  { %6514 = sst [smem:[#allocation48_spill]] %s6467_s10 }
   0xc   :  { %6515 = sst [smem:[#allocation49_spill]] %s6468_s11 }
   0xd   :  { %6516 = sst [smem:[#allocation50_spill]] %s6469_s12 }
   0xe   :  { %6517 = sst [smem:[#allocation51_spill]] %s6470_s13 }
   0xf   :  { %6518 = sst [smem:[#allocation52_spill]] %s6471_s14 }
  0x10   :  { %6519 = sst [smem:[#allocation53_spill]] %s6472_s15 }
  0x11   :  { %20 = vsyncpa [#allocation3], 0 }
  0x12   :  { %22 = vsyncpa [#allocation3 + $0x1], 0 }
  0x13   :  { %23 = vsyncpa [#allocation6], 0 }
  0x14   :  { %25 = vsyncpa [#allocation6 + $0x1], 0 }
  0x15   :  { %26 = vsyncpa [#allocation9], 0 }
  0x16   :  { %28 = vsyncpa [#allocation9 + $0x1], 0 }
  0x17   :  { %29 = vsyncpa [#allocation12], 0 }
  0x18   :  { %30 = vsyncpa [#allocation15], 0 }
  0x19   :  { %31 = vsyncpa [#allocation4], 0 }
  0x1a   :  { %33 = vsyncpa [#allocation4 + $0x1], 0  ;;  %s5624_s18 = smov 0   ;;  %s5626_s19 = smov 0  }
  0x1b   :  { %s5628_s20 = smov 0   ;;  %s5630_s21 = smov 0  }
  0x1c   :  { %s5632_s22 = smov 0   ;;  %s5634_s23 = smov 0  }
  0x1d   :  { %s5636_s24 = smov 0   ;;  %s5638_s25 = smov 0  }
  0x1e   :  { %s5640_s26 = smov 0   ;;  %s5642_s27 = smov 0  }
  0x1f   :  { %s5644_s28 = smov 0  }
  0x20 LB: > { %6520 = sst [smem:[#allocation24_spill]] %s5481_s19  ;;  %s5680_s29 = sadd.s32 4294967295, %s5517_s28   ;;  %s5517_s28 = sphi %s5644_s28, %s39_s28   ;;  %s5513_s27 = sphi %s5642_s27, %s6602_s27   ;;  %s5509_s26 = sphi %s5640_s26, %s6601_s26   ;;  %s5505_s25 = sphi %s5638_s25, %s6600_s25   ;;  %s5501_s24 = sphi %s5636_s24, %s6599_s24   ;;  %s5497_s23 = sphi %s5634_s23, %s6598_s23   ;;  %s5493_s22 = sphi %s5632_s22, %s6594_s22   ;;  %s5489_s21 = sphi %s5630_s21, %s6593_s21   ;;  %s5485_s20 = sphi %s5628_s20, %s6597_s20   ;;  %s5481_s19 = sphi %s5626_s19, %s6592_s19   ;;  %s5477_s18 = sphi %s5624_s18, %s6591_s18  }
  0x21   : > { %6521 = sst [smem:[#allocation25_spill]] %s5485_s20  ;;  %p4270_p0 = scmp.ge.s32.totalorder %s5517_s28, 1 }
  0x22   : > { %6522 = sst [smem:[#allocation26_spill]] %s5489_s21  ;;  %p6485_p1 = scmp.eq.s32.totalorder %s5680_s29, 0 }
  0x23   : > { %6523 = sst [smem:[#allocation27_spill]] %s5493_s22  ;;  %p426_p3 = scmp.lt.s32.totalorder %s5517_s28, 5 }
  0x24   : > { %6524 = sst [smem:[#allocation28_spill]] %s5497_s23  ;;  %s5519_s16 = smov [#allocation11]  }
  0x25   : > { %6525 = sst [smem:[#allocation29_spill]] %s5501_s24  ;;  %p5686_p4 = pnand %p4270_p0, %p426_p3 }
  0x26   : > { %6526 = sst [smem:[#allocation30_spill]] %s5505_s25  ;;  %s438_s17 = sshll.u32 %s5519_s16, 4  ;;  %s439_s17 = int_to_ptr.vmem [resolvable:$true] %s438_s17 }
  0x27   : > { %6527 = sst [smem:[#allocation31_spill]] %s5680_s29  ;;  %p4770_p5 = pneg %p5686_p4 }
  0x28   : > { %s6528_s30 = scalar_select %p5686_p4, 1, 0 }
  0x29   : > { %p5694_p6 = pnand %p4770_p5, %p6485_p1  ;;  %s5520_s25 = smov [#allocation14]  }
  0x2a   : > { %6529 = sst [smem:[#allocation32_spill]] %s6528_s30  ;;  %s470_s12 = sshll.u32 %s5520_s25, 4  ;;  %s471_s12 = int_to_ptr.vmem [resolvable:$true] %s470_s12 }
  0x2b   : > { %p5139_p7 = pneg %p5694_p6  ;;  %s5148_s10 = scalar_lea.vmem %s439_s17, 2048 }
  0x2c   : > { %p5149_p8 = scmp.ne.s32.totalorder %s439_s17, %s5148_s10  ;;  %p5156_p11 = scmp.lt.s32.totalorder %s439_s17, %s439_s17 }
  0x2d   : > { %p5157_p12 = scmp.lt.s32.totalorder %s5148_s10, %s5148_s10 }
  0x2e   : > { %p5151_p9 = pnand %p5149_p8, %p5139_p7 }
  0x2f   : > { %p5158_p13 = por %p5157_p12, %p5156_p11 }
  0x30   : > { %p5152_p10 = pneg %p5151_p9 }
  0x32   : > { %p5159_p0 = pnand %p5158_p13, %p5152_p10 }
  0x34   : > { %5162 = shalt.err (!%p5159_p0)
}
  0x35   : > { %s6477_s16 = smov 64   ;;  %s6479_s14 = smov 4  }
  0x36   : > { %s6531_s5 = sld [smem:[#allocation43_spill]]  ;;  %s5174_s8 = scalar_lea.vmem %s471_s12, 2048 }
  0x37   : > { %p5175_p3 = scmp.ne.s32.totalorder %s471_s12, %s5174_s8  ;;  %p5182_p9 = scmp.lt.s32.totalorder %s471_s12, %s471_s12 }
  0x38   : > { %p5183_p10 = scmp.lt.s32.totalorder %s5174_s8, %s5174_s8 }
  0x39   : > { %p5177_p5 = pnand %p5175_p3, %p5139_p7 }
  0x3a   : > { %p5184_p11 = por %p5183_p10, %p5182_p9 }
  0x3b   : > { %p5178_p8 = pneg %p5177_p5 }
  0x3c   : > { %4773 = dma.hbm_to_vmem [thread:$0]  (!%p5694_p6), %s6531_s5, 2048, %s439_s17, [#allocation12], %s6477_s16, %s6477_s16, %s6479_s14  }
  0x3d   : > { %p5185_p12 = pnand %p5184_p11, %p5178_p8 }
  0x3f   : > { %5188 = shalt.err (!%p5185_p12)
}
  0x40   : > { %s5523_s10 = smov 128   ;;  %s5524_s13 = smov 8  }
  0x41   : > { %s6532_s9 = sld [smem:[#allocation47_spill]]  ;;  %p68_p13 = scmp.eq.s32.totalorder %s5517_s28, 0 }
  0x42   : > { %p93_p0 = scmp.ne.s32.totalorder %s5485_s20, %s5481_s19  ;;  %p99_p3 = scmp.ne.s32.totalorder %s5481_s19, %s5477_s18 }
  0x43   : > { %p6484_p5 = scmp.lt.s32.totalorder %s5517_s28, 4  ;;  %s6486_s16 = sand.u32 1, %s5517_s28  }
  0x44   : > { %p95_p8 = por %p93_p0, %p68_p13  ;;  %p5731_p9 = por %p99_p3, %p6485_p1 }
  0x45   : > { %s534_s5 = sand.u32 1, %s5485_s20   ;;  %s4448_s24 = sshll.u32 %s5513_s27, 10 }
  0x46   : > { %s6533_s14 = scalar_select %p5731_p9, 1, 0 }
  0x47   : > { %4779 = dma.hbm_to_vmem [thread:$0]  (!%p5694_p6), %s6532_s9, 2048, %s471_s12, [#allocation15], %s5523_s10, %s5523_s10, %s5524_s13  }
  0x48   : > { %6534 = sst [smem:[#allocation33_spill]] %s6533_s14  ;;  %s4280_s6 = sshll.u32 %s534_s5, 6 }
  0x49   : > { %s6535_s1 = sld [smem:[#allocation39_spill]]  ;;  %p5742_p10 = pnand %p6484_p5, %p95_p8 }
  0x4a   : > { %s536_s18 = scalar_lea.vmem [#allocation5], %s4280_s6  ;;  %s5748_s17 = scalar_lea.sflag [#allocation6], %s6486_s16 }
  0x4b   : > { %s543_s13 = sshll.u32 %s536_s18, 4  ;;  %p5191_p11 = pneg %p5742_p10  ;;  %s544_s13 = int_to_ptr.vmem [resolvable:$true] %s543_s13 }
  0x4c   : > { %s5202_s25 = scalar_lea.vmem %s544_s13, 1024  ;;  %s5525_s30 = smov [#allocation5]  }
  0x4d   : > { %p5203_p12 = scmp.ne.s32.totalorder %s544_s13, %s5202_s25  ;;  %s5207_s8 = sshll.u32 %s5525_s30, 4  ;;  %s5208_s8 = int_to_ptr.vmem [resolvable:$false] %s5207_s8 }
  0x4e   : > { %p5210_p8 = scmp.lt.s32.totalorder %s544_s13, %s5208_s8 }
  0x4f   : > { %s542_s12 = scalar_lea.hbm %s6535_s1, %s4448_s24  ;;  %p5205_p0 = pnand %p5203_p12, %p5191_p11 }
  0x50   : > { %s5209_s1 = scalar_lea.vmem %s5208_s8, 2048 }
  0x51   : > { %p5206_p3 = pneg %p5205_p0  ;;  %p5211_p5 = scmp.lt.s32.totalorder %s5209_s1, %s5202_s25 }
  0x53   : > { %p5212_p1 = por %p5211_p5, %p5210_p8 }
  0x55   : > { %p5213_p2 = pnand %p5212_p1, %p5206_p3 }
  0x57   : > { %5216 = shalt.err (!%p5213_p2)
}
  0x58   : > { %s6537_s18 = smov 4   ;;  %s6538_s16 = smov 64  }
  0x59   : > { %4789 = dma.hbm_to_vmem [thread:$0]  (!%p5742_p10), %s542_s12, 1024, %s544_s13, %s5748_s17, %s6538_s16, %s6538_s16, %s6537_s18  }
  0x5a   : > { %s6539_s2 = sld [smem:[#allocation40_spill]]  ;;  %s557_s8 = scalar_lea.vmem [#allocation7], %s4280_s6 }
  0x5b   : > { %s564_s1 = sshll.u32 %s557_s8, 4  ;;  %s4286_s25 = sshll.u32 %s534_s5, 5  ;;  %s5766_s1 = int_to_ptr.vmem [resolvable:$true] %s564_s1 }
  0x5c   : > { %s4450_s19 = sshll.u32 %s5513_s27, 9  ;;  %s6540_s3 = sld [smem:[#allocation41_spill]] }
  0x5d   : > { %s578_s21 = scalar_lea.vmem [#allocation8], %s4286_s25  ;;  %s6541_s4 = sld [smem:[#allocation42_spill]] }
  0x5e   : > { %s585_s22 = sshll.u32 %s578_s21, 4  ;;  %s6542_s9 = sand.u32 1, %s5517_s28   ;;  %s586_s22 = int_to_ptr.vmem [resolvable:$true] %s585_s22 }
  0x5f   : > { %s5779_s14 = scalar_lea.sflag [#allocation9], %s6542_s9  ;;  %s5230_s6 = scalar_lea.vmem %s586_s22, 512 }
  0x60   : > { %s5764_s30 = scalar_lea.hbm %s6539_s2, %s4448_s24  ;;  %p5231_p1 = scmp.ne.s32.totalorder %s586_s22, %s5230_s6 }
  0x61   : > { %s5526_s5 = smov [#allocation8]  }
  0x62   : > { %s584_s29 = scalar_lea.hbm %s6540_s3, %s4450_s19  ;;  %p5233_p2 = pnand %p5231_p1, %p5191_p11 }
  0x63   : > { %s5775_s13 = scalar_lea.hbm %s6541_s4, %s4450_s19  ;;  %s5235_s0 = sshll.u32 %s5526_s5, 4  ;;  %s5236_s0 = int_to_ptr.vmem [resolvable:$false] %s5235_s0 }
  0x64   : > { %p5234_p5 = pneg %p5233_p2  ;;  %s5237_s20 = scalar_lea.vmem %s5236_s0, 1024 }
  0x65   : > { %p5238_p12 = scmp.lt.s32.totalorder %s586_s22, %s5236_s0  ;;  %p5239_p0 = scmp.lt.s32.totalorder %s5237_s20, %s5230_s6 }
  0x67   : > { %p5240_p3 = por %p5239_p0, %p5238_p12 }
  0x69   : > { %p5241_p8 = pnand %p5240_p3, %p5234_p5 }
  0x6b   : > { %5244 = shalt.err (!%p5241_p8)
}
  0x6c   : > { %4795 = dma.hbm_to_vmem [thread:$0]  (!%p5742_p10), %s584_s29, 512, %s586_s22, %s5779_s14, %s6538_s16, %s6538_s16, %s6537_s18  }
  0x6d   : > { %s599_s19 = scalar_lea.vmem [#allocation10], %s4286_s25  ;;  %s5527_s23 = smov [#allocation13]  }
  0x6e   : > { %s606_s21 = sshll.u32 %s599_s19, 4  ;;  %s454_s24 = sshll.u32 %s5527_s23, 4  ;;  %s5790_s21 = int_to_ptr.vmem [resolvable:$true] %s606_s21  ;;  %s455_s24 = int_to_ptr.vmem [resolvable:$true] %s454_s24 }
  0x6f   : > { %s5256_s8 = scalar_lea.vmem %s455_s24, 2048  ;;  %p5264_p12 = scmp.lt.s32.totalorder %s455_s24, %s455_s24 }
  0x70   : > { %p5257_p1 = scmp.ne.s32.totalorder %s455_s24, %s5256_s8  ;;  %p5265_p0 = scmp.lt.s32.totalorder %s5256_s8, %s5256_s8 }
  0x72   : > { %p5259_p2 = pnand %p5257_p1, %p5139_p7  ;;  %p5266_p3 = por %p5265_p0, %p5264_p12 }
  0x74   : > { %p5260_p5 = pneg %p5259_p2 }
  0x76   : > { %p5267_p8 = pnand %p5266_p3, %p5260_p5 }
  0x78   : > { %5270 = shalt.err (!%p5267_p8)
}
  0x79   : > { %s6543_s7 = sld [smem:[#allocation45_spill]]  ;;  %s5528_s25 = smov [#allocation16]  }
  0x7a   : > { %s486_s12 = sshll.u32 %s5528_s25, 4  ;;  %s487_s12 = int_to_ptr.vmem [resolvable:$true] %s486_s12 }
  0x7b   : > { %s5282_s9 = scalar_lea.vmem %s487_s12, 2048  ;;  %p5290_p12 = scmp.lt.s32.totalorder %s487_s12, %s487_s12 }
  0x7c   : > { %p5283_p1 = scmp.ne.s32.totalorder %s487_s12, %s5282_s9  ;;  %p5291_p0 = scmp.lt.s32.totalorder %s5282_s9, %s5282_s9 }
  0x7e   : > { %p5285_p2 = pnand %p5283_p1, %p5139_p7  ;;  %p5292_p3 = por %p5291_p0, %p5290_p12 }
  0x7f   : > { %4776 = dma.hbm_to_vmem [thread:$0]  (!%p5694_p6), %s6543_s7, 2048, %s455_s24, [#allocation12], %s6538_s16, %s6538_s16, %s6537_s18  }
  0x80   : > { %p5286_p5 = pneg %p5285_p2 }
  0x82   : > { %p5293_p8 = pnand %p5292_p3, %p5286_p5 }
  0x84   : > { %5296 = shalt.err (!%p5293_p8)
}
  0x85   : > { %s6544_s11 = sld [smem:[#allocation49_spill]]  ;;  %s4269_s15 = sadd.s32 4294967294, %s5517_s28  }
  0x86   : > { %s6545_s0 = sld [smem:[#allocation28_spill]]  ;;  %s48_s24 = sadd.s32 1, %s5509_s26 }
  0x87   : > { %s6546_s20 = sld [smem:[#allocation27_spill]]  ;;  %p49_p7 = scmp.ge.s32.totalorder %s48_s24, 2 }
  0x88   : > { %s6547_s19 = sld [smem:[#allocation26_spill]]  ;;  %s51_s8 = sadd.s32 1, %s5513_s27 }
  0x89   : > { %s6548_s23 = sld [smem:[#allocation31_spill]]  ;;  %s6604_s24 = smov (%p49_p7, %s48_s24), 0 }
  0x8a   : > { %6549 = sst [smem:[#allocation34_spill]] %s6604_s24  ;;  %s6606_s8 = smov (!%p49_p7, %s51_s8), %s5513_s27 }
  0x8b   : > { %4782 = dma.hbm_to_vmem [thread:$0]  (!%p5694_p6), %s6544_s11, 2048, %s487_s12, [#allocation15], %s6538_s16, %s6538_s16, %s6537_s18  }
  0x8c   : > { %s60_s22 = sadd.s32 1, %s6545_s0  ;;  %s6550_s29 = sld [smem:[#allocation25_spill]] }
  0x8d   : > { %p67_p1 = scmp.ne.s32.totalorder %s6545_s0, %s6546_s20  ;;  %s56_s25 = ssub.s32 %s5509_s26, %s6604_s24 }
  0x8e   : > { %p53_p2 = scmp.ge.s32.totalorder %s6606_s8, 2  ;;  %p73_p5 = scmp.ne.s32.totalorder %s6546_s20, %s6547_s19 }
  0x8f   : > { %p5827_p6 = por %p68_p13, %p67_p1  ;;  %p6552_p12 = scmp.eq.s32.totalorder %s6548_s23, 3 }
  0x90   : > { %p419_p3 = scmp.eq.s32.totalorder %s4269_s15, 3  ;;  %s6608_s8 = smov (%p53_p2, %s6606_s8), 0 }
  0x91   : > { %p5835_p0 = por %p6552_p12, %p67_p1  ;;  %6555 = sst [smem:[#allocation36_spill]] %s6608_s8 }
  0x92   : > { %p6556_p8 = scmp.eq.s32.totalorder %s6548_s23, 0  ;;  %p5847_p13 = por %p419_p3, %p73_p5 }
  0x93   : > { %s6553_s9 = scalar_select %p5835_p0, 1, 0 }
  0x94   : > { %p5843_p7 = por %p6556_p8, %p73_p5  ;;  %s55_s2 = ssub.s32 %s5513_s27, %s6608_s8 }
  0x95   : > { %6554 = sst [smem:[#allocation35_spill]] %s6553_s9  ;;  %s509_s20 = sand.u32 1, %s6545_s0  }
  0x96   : > { %s6558_s5 = scalar_select %p5847_p13, 1, 0 }
  0x97   : > { %s57_s19 = sor.u32 %s56_s25, %s55_s2  ;;  %p84_p1 = scmp.eq.s32.totalorder %s55_s2, 0 }
  0x98   : > { %6559 = sst [smem:[#allocation37_spill]] %s6558_s5  ;;  %p58_p2 = scmp.eq.s32.totalorder %s57_s19, 0 }
  0x99   : > { %s6560_s23 = sadd.s32 1, %s6550_s29  ;;  %s4276_s3 = sshll.u32 %s509_s20, 3 }
  0x9a   : > { %s6610_s29 = smov (!%p84_p1, %s6550_s29), %s6560_s23  ;;  %s4277_s4 = sshll.u32 %s5509_s26, 1 }
  0x9b   : > { %s5860_s15 = scalar_select %p58_p2, %s6545_s0, %s60_s22  }
  0x9c   : > { %s4278_s7 = sshll.u32 %s5513_s27, 2  ;;  %s513_s8 = scalar_lea.vmem [#allocation2], %s4276_s3 }
  0x9d   : > { %s519_s11 = sadd.s32 %s4278_s7, %s4277_s4  ;;  %s522_s24 = sshll.u32 %s513_s8, 4  ;;  %s5866_s24 = int_to_ptr.vmem [resolvable:$true] %s522_s24 }
  0x9e   : > { %s4279_s5 = sshll.u32 %s519_s11, 6  ;;  %s6561_s9 = sld [smem:[#allocation38_spill]] }
  0x9f   : > { %p6562_p5 = scmp.lt.s32.totalorder %s5517_s28, 4  ;;  %s5310_s23 = scalar_lea.vmem %s5766_s1, 1024 }
  0xa0   : > { %p5311_p3 = scmp.ne.s32.totalorder %s5766_s1, %s5310_s23  ;;  %s5529_s3 = smov [#allocation7]  }
  0xa1   : > { %p5877_p12 = pnand %p6562_p5, %p5827_p6  ;;  %s5315_s4 = sshll.u32 %s5529_s3, 4  ;;  %s5316_s4 = int_to_ptr.vmem [resolvable:$false] %s5315_s4 }
  0xa2   : > { %p5313_p8 = pnand %p5311_p3, %p5191_p11  ;;  %s5317_s7 = scalar_lea.vmem %s5316_s4, 2048 }
  0xa3   : > { %p5318_p2 = scmp.lt.s32.totalorder %s5766_s1, %s5316_s4  ;;  %p5319_p13 = scmp.lt.s32.totalorder %s5317_s7, %s5310_s23 }
  0xa4   : > { %s5871_s19 = scalar_lea.hbm %s6561_s9, %s4279_s5  ;;  %p5314_p1 = pneg %p5313_p8 }
  0xa5   : > { %p5320_p0 = por %p5319_p13, %p5318_p2 }
  0xa7   : > { %p5321_p9 = pnand %p5320_p0, %p5314_p1 }
  0xa9   : > { %5324 = shalt.err (!%p5321_p9)
}
  0xaa   : > { %4792 = dma.hbm_to_vmem [thread:$0]  (!%p5742_p10), %s5764_s30, 1024, %s5766_s1, %s5748_s17, %s6538_s16, %s6538_s16, %s6537_s18  }
  0xab   : > { %s510_s11 = scalar_lea.sflag [#allocation3], %s509_s20  ;;  %p5327_p6 = pneg %p5877_p12 }
  0xac   : > { %s5338_s8 = scalar_lea.vmem %s5866_s24, 128  ;;  %s5530_s12 = smov [#allocation2]  }
  0xad   : > { %p5339_p9 = scmp.ne.s32.totalorder %s5866_s24, %s5338_s8  ;;  %s5343_s9 = sshll.u32 %s5530_s12, 4  ;;  %s5344_s9 = int_to_ptr.vmem [resolvable:$false] %s5343_s9 }
  0xae   : > { %s5345_s5 = scalar_lea.vmem %s5344_s9, 256  ;;  %p5346_p5 = scmp.lt.s32.totalorder %s5866_s24, %s5344_s9 }
  0xaf   : > { %p5341_p0 = pnand %p5339_p9, %p5327_p6  ;;  %p5347_p3 = scmp.lt.s32.totalorder %s5345_s5, %s5338_s8 }
  0xb1   : > { %p5342_p13 = pneg %p5341_p0  ;;  %p5348_p8 = por %p5347_p3, %p5346_p5 }
  0xb3   : > { %p5349_p1 = pnand %p5348_p8, %p5342_p13 }
  0xb5   : > { %5352 = shalt.err (!%p5349_p1)
}
  0xb6   : > { %4786 = dma.hbm_to_vmem [thread:$0]  (!%p5877_p12), %s5871_s19, 128, %s5866_s24, %s510_s11, %s6538_s16, %s6538_s16, %s6537_s18  }
  0xb7   : > { %s5366_s17 = scalar_lea.vmem %s5790_s21, 512  ;;  %s5531_s30 = smov [#allocation10]  }
  0xb8   : > { %p5367_p2 = scmp.ne.s32.totalorder %s5790_s21, %s5366_s17  ;;  %s5371_s1 = sshll.u32 %s5531_s30, 4  ;;  %s5372_s1 = int_to_ptr.vmem [resolvable:$false] %s5371_s1 }
  0xb9   : > { %s5373_s0 = scalar_lea.vmem %s5372_s1, 1024  ;;  %p5374_p0 = scmp.lt.s32.totalorder %s5790_s21, %s5372_s1 }
  0xba   : > { %p5369_p6 = pnand %p5367_p2, %p5191_p11  ;;  %p5375_p13 = scmp.lt.s32.totalorder %s5373_s0, %s5366_s17 }
  0xbc   : > { %p5370_p9 = pneg %p5369_p6  ;;  %p5376_p5 = por %p5375_p13, %p5374_p0 }
  0xbe   : > { %p5377_p3 = pnand %p5376_p5, %p5370_p9 }
  0xc0   : > { %5380 = shalt.err (!%p5377_p3)
}
  0xc1   : > { %4798 = dma.hbm_to_vmem [thread:$0]  (!%p5742_p10), %s5775_s13, 512, %s5790_s21, %s5779_s14, %s6538_s16, %s6538_s16, %s6537_s18  }
  0xc2   : > { %618 = sbr.rel (%p5686_p4) target bundleno = 4501 (0x1195), region = 80  ;;  %s6565_s20 = sld [smem:[#allocation27_spill]] (!%p5686_p4) }
  0xc8   : > { %s5926_s25 = sand.u32 1, %s6565_s20  }
  0xc9   : > { %s4293_s2 = sshll.u32 %s5926_s25, 3  ;;  %s621_s19 = scalar_lea.sflag [#allocation3], %s5926_s25 }
  0xca   : > { %s5930_s22 = scalar_lea.vmem [#allocation2], %s4293_s2 }
  0xcb   : > { %5452 = dma.done.wait (%p5843_p7), %s621_s19, 128  }
  0xcc   : > { %5454 = vsyncadd (%p5843_p7), %s621_s19, 4294967168  ;;  %s6566_s10 = sld [smem:[#allocation31_spill]] }
  0xcd   : > { %s6567_s16 = sld [smem:[#allocation24_spill]] }
  0xce   : > { %s6568_s18 = sld [smem:[#allocation33_spill]] }
  0xd2   : > { %s629_s13 = sand.u32 1, %s6566_s10  }
  0xd3   : > { %s631_s14 = sand.u32 1, %s6567_s16   ;;  %s630_s23 = scalar_lea.sflag [#allocation6], %s629_s13 }
  0xd4   : > { %s4294_s21 = sshll.u32 %s631_s14, 6  ;;  %p6569_p4 = scmp.ne.s32.totalorder %s6568_s18, 0 }
  0xd5   : > { %s5938_s3 = scalar_lea.vmem [#allocation5], %s4294_s21 }
  0xd6   : > { %5456 = dma.done.wait (%p6569_p4), %s630_s23, 2048  }
  0xd7   : > { %5458 = vsyncadd (%p6569_p4), %s630_s23, 4294965248  ;;  %s4296_s4 = sshll.u32 %s631_s14, 5  ;;  %s5944_s7 = scalar_lea.vmem [#allocation7], %s4294_s21 }
  0xd8   : > { %s648_s6 = scalar_lea.sflag [#allocation9], %s629_s13  ;;  %s5946_s11 = scalar_lea.vmem [#allocation8], %s4296_s4 }
  0xd9   : > { %5460 = dma.done.wait (%p6569_p4), %s648_s6, 1024  }
  0xda   : > { %5462 = vsyncadd (%p6569_p4), %s648_s6, 4294966272  ;;  %s5952_s8 = scalar_lea.vmem [#allocation10], %s4296_s4  ;;  %p6570_p10 = scmp.eq.s32.totalorder %s6566_s10, 0 }
  0xdc   : > { %5464 = dma.done.wait (%p6570_p10), [#allocation12], 4096   ;;  %p6571_p11 = pmov %p6570_p10 }
  0xdd   : > { %p6572_p7 = pmov %p6570_p10 }
  0xde   : > { %5466 = vsyncadd (%p6571_p11), [#allocation12], 4294963200 }
  0xdf   : > { %5468 = dma.done.wait (%p6572_p7), [#allocation15], 4096   ;;  %p6573_p12 = pmov %p6572_p7 }
  0xe0   : > { %v5532_v0 = vmov 0.0   ;;  %vm5533_vm0 = vmmov 0   ;;  %v4950_v1 = vld [vmem:[#allocation11 + $0x38] sm:$0xff]   ;;  %v4951_v2 = vld [vmem:[#allocation11 + $0x30] sm:$0xff]   ;;  %v4952_v3 = vld [vmem:[#allocation11 + $0x28] sm:$0xff]   ;;  %s6574_s5 = sld [smem:[#allocation44_spill]]  ;;  %v750_v21 = vlaneseq }
  0xe1   : > { %5470 = vsyncadd (%p6573_p12), [#allocation15], 4294963200  ;;  %4550 = vmatprep.subr.bf16.mxu0 %v5532_v0  ;;  %4566 = vmatprep.mubr.msk.bf16.mxu0 %vm5533_vm0, %v5532_v0  ;;  %v4953_v4 = vld [vmem:[#allocation11 + $0x20] sm:$0xff]   ;;  %v4954_v5 = vld [vmem:[#allocation11 + $0x18] sm:$0xff]   ;;  %vm1236_vm1 = vcmask 261120   ;;  %s5534_s17 = smov 64  }
  0xe2   : > { %4570 = vmatprep.subr.bf16.mxu1 %v5532_v0  ;;  %4574 = vmatprep.mubr.msk.bf16.mxu1 %vm5533_vm0, %v5532_v0  ;;  %v4955_v6 = vld [vmem:[#allocation11 + $0x10] sm:$0xff]   ;;  %v4956_v7 = vld [vmem:[#allocation11 + $0x8] sm:$0xff]   ;;  %v4957_v8 = vld [vmem:[#allocation11] sm:$0xff]   ;;  %s5535_s30 = smov 96   ;;  %s5536_s1 = smov 32   ;;  %v5995_v28 = vshrl.u32 %v750_v21, 7 }
  0xe3   : > { %4551 = vmatpush3.bf16.msra.mxu0 %v4950_v1  ;;  %v746_v9 = vld [vmem:[%s5930_s22] sm:$0xff]   ;;  %v4959_v12 = vld [vmem:[%s5938_s3 + $0x8] sm:$0xff]   ;;  %v4960_v19 = vld [vmem:[%s5938_s3] sm:$0xff]   ;;  %v5537_v22 = vmov 1983009808   ;;  %s6575_s0 = sld [smem:[#allocation29_spill]] }
  0xe4   : > { %4552 = vmatprep.subr.bf16.mxu0 %v5532_v0  ;;  %v1244_v15 = vsel %vm1236_vm1, %v4959_v12, 0  ;;  %v1241_v20 = vsel %vm1236_vm1, %v4960_v19, 0  ;;  %v953_v23 = vunpack.c.l.s4 %v5537_v22  ;;  %v5538_v26 = vmov 1934713408   ;;  %s6576_s19 = sld [smem:[#allocation46_spill]]  ;;  %s5541_s2 = smov [#allocation17]  }
  0xe5   : > { %4571 = vmatpush3.bf16.xpose.msra.mxu1 %v1244_v15  ;;  %v985_v27 = vunpack.c.l.s4 %v5538_v26  ;;  %vm2081_vm4 = vcmask 523264   ;;  %vm2084_vm5 = vcmask 785408   ;;  %s6578_s18 = sld [smem:[#allocation51_spill]]  ;;  %vm2895_vm10 = vcmask 130048  }
  0xe6   : > { %v4304_v10 = vld [vmem:[%s6574_s5] ss:$0 sm:$0xff]  ;;  %4572 = vmatprep.subr.bf16.mxu1 %v5532_v0  ;;  %v954_v29 = vunpack.c.0.s8 %v953_v23  ;;  %s6580_s23 = sld [smem:[#allocation52_spill]] }
  0xe7   : > { %4553 = vmatpush3.bf16.msra.mxu0 %v4951_v2  ;;  %v986_v34 = vunpack.c.0.s8 %v985_v27 }
  0xe8   : > { %4554 = vmatprep.subr.bf16.mxu0 %v5532_v0  ;;  %v5998_v35 = vsub.s32 %v954_v29, %v5995_v28 }
  0xe9   : > { %v6003_v46 = vsub.s32 %v986_v34, %v5995_v28  ;;  %s4303_s24 = sshll.u32 %s6575_s0, 4  ;;  %s4443_s14 = sshll.u32 %s6575_s0, 1 }
  0xea   : > { %s6577_s10 = smov %s6576_s19 }
  0xeb   : > { %4555 = vmatpush3.bf16.msra.mxu0 %v4952_v3  ;;  %s6579_s13 = smov %s6578_s18 }
  0xec   : > { %4556 = vmatprep.subr.bf16.mxu0 %v5532_v0 }
  0xed   : > { %4573 = vmatpush3.bf16.xpose.msra.mxu1 %v1241_v20 }
  0xee   : > { %4578 = vmatprep.subr.bf16.mxu1 %v5532_v0 }
  0xef   : > { %4557 = vmatpush3.bf16.msra.mxu0 %v4953_v4 }
  0xf0   : > { %4558 = vmatprep.subr.bf16.mxu0 %v5532_v0 }
  0xf3   : > { %4559 = vmatpush3.bf16.msra.mxu0 %v4954_v5 }
  0xf4   : > { %4560 = vmatprep.subr.bf16.mxu0 %v5532_v0 }
  0xf7   : > { %4561 = vmatpush3.bf16.msra.mxu0 %v4955_v6 }
  0xf8   : > { %4562 = vmatprep.subr.bf16.mxu0 %v5532_v0 }
  0xfb   : > { %4563 = vmatpush3.bf16.msra.mxu0 %v4956_v7 }
  0xfc   : > { %4564 = vmatprep.subr.bf16.mxu0 %v5532_v0 }
  0xff   : > { %4565 = vmatpush3.bf16.msra.mxu0 %v4957_v8 }
 0x100   : > { %4602 = vmatprep.subr.bf16.mxu0 %v5532_v0 }
 0x102   : > { %4567 = vmatmul.mubr.bf16.vlgmr.msra.gmra.mxu0 %v746_v9 }
 0x103   : > { %4606 = vmatprep.mubr.msk.bf16.mxu0 %vm5533_vm0, %v5532_v0 }
 0x1c2   : > { %v923_v11 = vpop.f32.mrf.mxu0 }
 0x1c3   : > { %v924_v13 = vadd.f32 %v4304_v10, %v923_v11 }
 0x1c4   : > { %v4568_v14 = vpop.f32.mrf.mxu0 }
 0x1c5   : > { %938 = vrot.lane.b32.xlu1 %v924_v13, %s5534_s17  ;;  %932 = vrot.lane.b32.xlu0 %v924_v13, %s5535_s30 }
 0x1c6   : > { %v926_v16 = vpop.f32.mrf.mxu0 }
 0x1c7   : > { %v927_v17 = vadd.f32 %v4304_v10, %v926_v16 }
 0x1c8   : > { %v4569_v18 = vpop.f32.mrf.mxu0 }
 0x1c9   : > { %940 = vrot.lane.b32.xlu1 %v927_v17, %s5534_s17  ;;  %934 = vrot.lane.b32.xlu0 %v927_v17, %s5535_s30 }
 0x1cd   : > { %946 = vrot.lane.b32.xlu1 %v927_v17, %s5536_s1  ;;  %944 = vrot.lane.b32.xlu0 %v924_v13, %s5536_s1 }
 0x237   : > { %v939_v24 = vpop.permute.xlu1 %938  ;;  %v933_v25 = vpop.permute.xlu0 %932 }
 0x238   : > { %v950_v36 = vcombine.low %v924_v13, %v939_v24  ;;  %v951_v37 = vcombine.high %v924_v13, %v939_v24 }
 0x23a   : > { %v958_v51 = vrot.slane %v950_v36, %v5998_v35  ;;  %v965_v52 = vrot.slane %v951_v37, %v5998_v35 }
 0x23b   : > { %v941_v30 = vpop.permute.xlu1 %940  ;;  %v935_v31 = vpop.permute.xlu0 %934 }
 0x23c   : > { %v1018_v32 = vcombine.low %v927_v17, %v941_v30  ;;  %v1019_v33 = vcombine.high %v927_v17, %v941_v30 }
 0x23e   : > { %v1026_v44 = vrot.slane %v1018_v32, %v5998_v35  ;;  %v1033_v45 = vrot.slane %v1019_v33, %v5998_v35  ;;  %v4961_v32 = vld [vmem:[%s5938_s3 + $0x18] sm:$0xff]  }
 0x23f   : > { %v947_v38 = vpop.permute.xlu1 %946  ;;  %v945_v39 = vpop.permute.xlu0 %944  ;;  %v1304_v37 = vsel %vm1236_vm1, %v4961_v32, 0 }
 0x240   : > { %v1034_v40 = vcombine.low %v935_v31, %v947_v38  ;;  %v1035_v41 = vcombine.high %v935_v31, %v947_v38  ;;  %v966_v42 = vcombine.low %v933_v25, %v945_v39  ;;  %v967_v43 = vcombine.high %v933_v25, %v945_v39  ;;  %v4962_v38 = vld [vmem:[%s5938_s3 + $0x10] sm:$0xff]  }
 0x241   : > { %v1301_v39 = vsel %vm1236_vm1, %v4962_v38, 0 }
 0x242   : > { %v1042_v47 = vrot.slane %v1034_v40, %v5998_v35  ;;  %v1049_v48 = vrot.slane %v1035_v41, %v5998_v35  ;;  %v974_v49 = vrot.slane %v966_v42, %v5998_v35  ;;  %v981_v50 = vrot.slane %v967_v43, %v5998_v35  ;;  %v4963_v42 = vld [vmem:[%s5938_s3 + $0x28] sm:$0xff]  }
 0x244   : > { %v1050_v53 = vcombine.low %v1026_v44, %v1042_v47  ;;  %v1051_v54 = vcombine.high %v1026_v44, %v1042_v47  ;;  %v1066_v55 = vcombine.low %v1033_v45, %v1049_v48  ;;  %v1067_v56 = vcombine.high %v1033_v45, %v1049_v48  ;;  %v4964_v45 = vld [vmem:[%s5938_s3 + $0x20] sm:$0xff]  }
 0x245   : > { %v982_v57 = vcombine.low %v958_v51, %v974_v49  ;;  %v983_v58 = vcombine.high %v958_v51, %v974_v49  ;;  %v998_v59 = vcombine.low %v965_v52, %v981_v50  ;;  %v999_v60 = vcombine.high %v965_v52, %v981_v50 }
 0x246   : > { %v1058_v61 = vrot.slane %v1050_v53, %v6003_v46  ;;  %v1065_v62 = vrot.slane %v1051_v54, %v6003_v46  ;;  %v1074_v63 = vrot.slane %v1066_v55, %v6003_v46  ;;  %v1081_v1 = vrot.slane %v1067_v56, %v6003_v46 }
 0x247   : > { %v990_v2 = vrot.slane %v982_v57, %v6003_v46  ;;  %v997_v3 = vrot.slane %v983_v58, %v6003_v46  ;;  %v1006_v4 = vrot.slane %v998_v59, %v6003_v46  ;;  %v1013_v5 = vrot.slane %v999_v60, %v6003_v46  ;;  %v4965_v58 = vld [vmem:[%s5938_s3 + $0x38] sm:$0xff]  }
 0x248   : > { %v1154_v6 = vcombine.low %v1058_v61, %v1065_v62  ;;  %v4316_v7 = vcombine.high %v1058_v61, %v1065_v62  ;;  %v1170_v8 = vcombine.low %v1074_v63, %v1081_v1  ;;  %v4317_v9 = vcombine.high %v1074_v63, %v1081_v1  ;;  %v4966_v61 = vld [vmem:[%s5938_s3 + $0x30] sm:$0xff]   ;;  %s6581_s3 = smov %s6580_s23 }
 0x249   : > { %v1086_v10 = vcombine.low %v990_v2, %v997_v3  ;;  %v4314_v11 = vcombine.high %v990_v2, %v997_v3  ;;  %v1102_v12 = vcombine.low %v1006_v4, %v1013_v5  ;;  %v4315_v13 = vcombine.high %v1006_v4, %v1013_v5 }
 0x24a   : > { %v1161_v14 = vrot.slane %v1154_v6, %v5998_v35  ;;  %v1169_v15 = vrot.slane %v4316_v7, %v5998_v35  ;;  %v1177_v16 = vrot.slane %v1170_v8, %v5998_v35  ;;  %v1185_v17 = vrot.slane %v4317_v9, %v5998_v35 }
 0x24b   : > { %v1093_v18 = vrot.slane %v1086_v10, %v5998_v35  ;;  %v1101_v19 = vrot.slane %v4314_v11, %v5998_v35  ;;  %v1109_v20 = vrot.slane %v1102_v12, %v5998_v35  ;;  %v1117_v22 = vrot.slane %v4315_v13, %v5998_v35 }
 0x24c   : > { %v1186_v23 = vcombine.low %v1161_v14, %v1169_v15  ;;  %v1202_v24 = vcombine.low %v1177_v16, %v1185_v17  ;;  %v1364_v44 = vsel %vm1236_vm1, %v4963_v42, 0  ;;  %v1187_v47 = vcombine.high %v1161_v14, %v1169_v15 }
 0x24d   : > { %v1118_v25 = vcombine.low %v1093_v18, %v1101_v19  ;;  %v1134_v26 = vcombine.low %v1109_v20, %v1117_v22  ;;  %v1203_v48 = vcombine.high %v1177_v16, %v1185_v17  ;;  %v1119_v49 = vcombine.high %v1093_v18, %v1101_v19 }
 0x24e   : > { %v1194_v27 = vrot.slane %v1186_v23, %v6003_v46  ;;  %v1210_v29 = vrot.slane %v1202_v24, %v6003_v46  ;;  %v1135_v50 = vcombine.high %v1109_v20, %v1117_v22  ;;  %v1361_v51 = vsel %vm1236_vm1, %v4964_v45, 0 }
 0x24f   : > { %v1126_v30 = vrot.slane %v1118_v25, %v6003_v46  ;;  %v1142_v31 = vrot.slane %v1134_v26, %v6003_v46  ;;  %v1201_v52 = vrot.slane %v1187_v47, %v6003_v46  ;;  %v1217_v53 = vrot.slane %v1203_v48, %v6003_v46 }
 0x250   : > { %v1218_v33 = vcombine.low %v1194_v27, %v1210_v29  ;;  %v1219_v41 = vcombine.high %v1194_v27, %v1210_v29  ;;  %v1133_v54 = vrot.slane %v1119_v49, %v6003_v46  ;;  %v1149_v55 = vrot.slane %v1135_v50, %v6003_v46 }
 0x251   : > { %v1150_v34 = vcombine.low %v1126_v30, %v1142_v31  ;;  %v1151_v40 = vcombine.high %v1126_v30, %v1142_v31  ;;  %v1220_v57 = vcombine.low %v1201_v52, %v1217_v53  ;;  %v1424_v60 = vsel %vm1236_vm1, %v4965_v58, 0 }
 0x252   : > { %v1152_v56 = vcombine.low %v1133_v54, %v1149_v55  ;;  %v1421_v62 = vsel %vm1236_vm1, %v4966_v61, 0  ;;  %v1153_v63 = vcombine.high %v1133_v54, %v1149_v55  ;;  %v1221_v1 = vcombine.high %v1201_v52, %v1217_v53 }
 0x253   : > { %v1222_v36 = vpack.c.bf16 %v1218_v33, %v1150_v34  ;;  %v1223_v43 = vpack.c.bf16 %v1219_v41, %v1151_v40  ;;  %v754_v3 = vstv %s4303_s24  ;;  %v758_v5 = vand.u32 127, %v750_v21  ;;  %s6582_s24 = sld [smem:[#allocation48_spill]] }
 0x254   : > { %v1224_v59 = vpack.c.bf16 %v1220_v57, %v1152_v56  ;;  %v1225_v2 = vpack.c.bf16 %v1221_v1, %v1153_v63  ;;  %v755_v4 = vadd.s32 %v754_v3, %v5995_v28  ;;  %v752_v6 = vadd.s32 8, %v5995_v28 }
 0x255   : > { %4575 = vmatmul.mubr.msk.bf16.vlgmr.msra.gmra.mxu1 %vm1236_vm1, %v1222_v36  ;;  %v5539_v8 = vmov -1e+09  }
 0x256   : > { %4579 = vmatpush3.bf16.xpose.msra.mxu1 %v1304_v37  ;;  %4582 = vmatprep.mubr.msk.bf16.mxu1 %vm5533_vm0, %v5532_v0  ;;  %vm759_vm2 = vcmp.le.s32.totalorder %v758_v5, %v755_v4  ;;  %v756_v7 = vadd.s32 %v754_v3, %v752_v6 }
 0x257   : > { %4580 = vmatprep.subr.bf16.mxu1 %v5532_v0  ;;  %v761_v9 = vsel %vm759_vm2, 0.0, %v5539_v8 }
 0x258   : > { %vm760_vm3 = vcmp.le.s32.totalorder %v758_v5, %v756_v7 }
 0x259   : > { %v762_v13 = vsel %vm760_vm3, 0.0, %v5539_v8 }
 0x25e   : > { %4581 = vmatpush3.bf16.xpose.msra.mxu1 %v1301_v39 }
 0x25f   : > { %4586 = vmatprep.subr.bf16.mxu1 %v5532_v0 }
 0x265   : > { %4583 = vmatmul.mubr.msk.bf16.vlgmr.msra.gmra.mxu1 %vm1236_vm1, %v1223_v43 }
 0x266   : > { %4587 = vmatpush3.bf16.xpose.msra.mxu1 %v1364_v44  ;;  %4590 = vmatprep.mubr.msk.bf16.mxu1 %vm5533_vm0, %v5532_v0 }
 0x267   : > { %4588 = vmatprep.subr.bf16.mxu1 %v5532_v0 }
 0x26e   : > { %4589 = vmatpush3.bf16.xpose.msra.mxu1 %v1361_v51 }
 0x26f   : > { %4594 = vmatprep.subr.bf16.mxu1 %v5532_v0 }
 0x275   : > { %4591 = vmatmul.mubr.msk.bf16.vlgmr.msra.gmra.mxu1 %vm1236_vm1, %v1224_v59 }
 0x276   : > { %4595 = vmatpush3.bf16.xpose.msra.mxu1 %v1424_v60  ;;  %4598 = vmatprep.mubr.msk.bf16.mxu1 %vm5533_vm0, %v5532_v0 }
 0x277   : > { %4596 = vmatprep.subr.bf16.mxu1 %v5532_v0 }
 0x27e   : > { %4597 = vmatpush3.bf16.xpose.msra.mxu1 %v1421_v62 }
 0x27f   : > { %4610 = vmatprep.subr.bf16.mxu1 %v5532_v0 }
 0x285   : > { %4599 = vmatmul.mubr.msk.bf16.vlgmr.msra.gmra.mxu1 %vm1236_vm1, %v1225_v2 }
 0x286   : > { %4614 = vmatprep.mubr.msk.bf16.mxu1 %vm5533_vm0, %v5532_v0 }
 0x315   : > { %v1280_v10 = vpop.f32.mrf.mxu1 }
 0x316   : > { %v1281_v11 = vadd.f32 %v1280_v10, %v761_v9 }
 0x317   : > { %v4576_v12 = vpop.f32.mrf.mxu1 }
 0x318   : > { %v1467_v14 = vsel %vm1236_vm1, %v1281_v11, -inf }
 0x319   : > { %1468 = vmax.xlane.f32.xlu0 %v1467_v14  ;;  %v1283_v15 = vpop.f32.mrf.mxu1 }
 0x31a   : > { %v1284_v16 = vadd.f32 %v1283_v15, %v762_v13 }
 0x31b   : > { %v4577_v17 = vpop.f32.mrf.mxu1 }
 0x31c   : > { %v1470_v18 = vsel %vm1236_vm1, %v1284_v16, -inf  ;;  %v4969_v17 = vld [vmem:[%s5944_s7 + $0x18] sm:$0xff]  }
 0x31d   : > { %1471 = vmax.xlane.f32.xlu1 %v1470_v18  ;;  %4611 = vmatpush3.bf16.msra.mxu1 %v4969_v17 }
 0x31e   : > { %4612 = vmatprep.subr.bf16.mxu1 %v5532_v0 }
 0x325   : > { %v1340_v21 = vpop.f32.mrf.mxu1 }
 0x326   : > { %v1341_v19 = vadd.f32 %v1340_v21, %v761_v9 }
 0x327   : > { %v4584_v20 = vpop.f32.mrf.mxu1 }
 0x328   : > { %v1473_v22 = vsel %vm1236_vm1, %v1341_v19, -inf }
 0x329   : > { %1474 = vmax.xlane.f32.xlu0 %v1473_v22  ;;  %v1343_v23 = vpop.f32.mrf.mxu1  ;;  %v4970_v22 = vld [vmem:[%s5944_s7 + $0x10] sm:$0xff]  }
 0x32a   : > { %v1344_v24 = vadd.f32 %v1343_v23, %v762_v13  ;;  %4613 = vmatpush3.bf16.msra.mxu1 %v4970_v22 }
 0x32b   : > { %v4585_v25 = vpop.f32.mrf.mxu1  ;;  %4626 = vmatprep.subr.bf16.mxu1 %v5532_v0 }
 0x32c   : > { %v1476_v26 = vsel %vm1236_vm1, %v1344_v24, -inf }
 0x32d   : > { %1477 = vmax.xlane.f32.xlu0 %v1476_v26 }
 0x335   : > { %v1400_v27 = vpop.f32.mrf.mxu1 }
 0x336   : > { %v1401_v29 = vadd.f32 %v1400_v27, %v761_v9 }
 0x337   : > { %v4592_v30 = vpop.f32.mrf.mxu1 }
 0x338   : > { %v1479_v31 = vsel %vm1236_vm1, %v1401_v29, -inf }
 0x339   : > { %1480 = vmax.xlane.f32.xlu1 %v1479_v31  ;;  %v1403_v32 = vpop.f32.mrf.mxu1 }
 0x33a   : > { %v1404_v33 = vadd.f32 %v1403_v32, %v762_v13 }
 0x33b   : > { %v4593_v34 = vpop.f32.mrf.mxu1 }
 0x33c   : > { %v1482_v36 = vsel %vm1236_vm1, %v1404_v33, -inf }
 0x33d   : > { %1483 = vmax.xlane.f32.xlu0 %v1482_v36 }
 0x345   : > { %v1460_v37 = vpop.f32.mrf.mxu1 }
 0x346   : > { %v1461_v38 = vadd.f32 %v1460_v37, %v761_v9  ;;  %v4967_v9 = vld [vmem:[%s5944_s7 + $0x8] sm:$0xff]  }
 0x347   : > { %v4600_v39 = vpop.f32.mrf.mxu1  ;;  %4603 = vmatpush3.bf16.msra.mxu0 %v4967_v9  ;;  %v4971_v37 = vld [vmem:[%s5944_s7 + $0x28] sm:$0xff]  }
 0x348   : > { %v1485_v40 = vsel %vm1236_vm1, %v1461_v38, -inf  ;;  %4604 = vmatprep.subr.bf16.mxu0 %v5532_v0  ;;  %v4972_v39 = vld [vmem:[%s5944_s7 + $0x20] sm:$0xff]  }
 0x349   : > { %1486 = vmax.xlane.f32.xlu1 %v1485_v40  ;;  %v1463_v41 = vpop.f32.mrf.mxu1 }
 0x34a   : > { %v1464_v42 = vadd.f32 %v1463_v41, %v762_v13 }
 0x34b   : > { %v4601_v43 = vpop.f32.mrf.mxu1 }
 0x34c   : > { %v1488_v44 = vsel %vm1236_vm1, %v1464_v42, -inf }
 0x34d   : > { %1489 = vmax.xlane.f32.xlu0 %v1488_v44 }
 0x3a2   : > { %v1469_v45 = vpop.xlane.xlu0 %1468 }
 0x3a3   : > { %v1491_v47 = vsub.f32 %v1281_v11, %v1469_v45  ;;  %v4968_v11 = vld [vmem:[%s5944_s7] sm:$0xff]  }
 0x3a4   : > { %4605 = vmatpush3.bf16.msra.mxu0 %v4968_v11 }
 0x3a5   : > { %v1499_v48 = vmul.f32 1.442695, %v1491_v47  ;;  %4618 = vmatprep.subr.bf16.mxu0 %v5532_v0  ;;  %v4973_v47 = vld [vmem:[%s5944_s7 + $0x38] sm:$0xff]  }
 0x3a6   : > { %v1472_v49 = vpop.xlane.xlu1 %1471 }
 0x3a7   : > { %5048 = vpow2.f32 %v1499_v48  ;;  %v1492_v50 = vsub.f32 %v1284_v16, %v1472_v49  ;;  %v4974_v49 = vld [vmem:[%s5944_s7 + $0x30] sm:$0xff]  }
 0x3a9   : > { %v1501_v51 = vmul.f32 1.442695, %v1492_v50 }
 0x3ab   : > { %5050 = vpow2.f32 %v1501_v51 }
 0x3b2   : > { %v1475_v52 = vpop.xlane.xlu0 %1474 }
 0x3b3   : > { %v1493_v53 = vsub.f32 %v1341_v19, %v1475_v52 }
 0x3b4   : > { %v6077_v54 = vpop.eup %5048 }
 0x3b5   : > { %v1503_v55 = vmul.f32 1.442695, %v1493_v53  ;;  %v1515_v56 = vsel %vm1236_vm1, %v6077_v54, 0.0 }
 0x3b6   : > { %v1478_v57 = vpop.xlane.xlu0 %1477  ;;  %1516 = vadd.xlane.f32.xlu1 %v1515_v56 }
 0x3b7   : > { %5052 = vpow2.f32 %v1503_v55  ;;  %v1494_v58 = vsub.f32 %v1344_v24, %v1478_v57 }
 0x3b8   : > { %v5051_v59 = vpop.eup %5050 }
 0x3b9   : > { %v1505_v60 = vmul.f32 1.442695, %v1494_v58  ;;  %v1518_v61 = vsel %vm1236_vm1, %v5051_v59, 0.0 }
 0x3ba   : > { %1519 = vadd.xlane.f32.xlu0 %v1518_v61 }
 0x3bb   : > { %5054 = vpow2.f32 %v1505_v60 }
 0x3c2   : > { %v1481_v62 = vpop.xlane.xlu1 %1480 }
 0x3c3   : > { %v1495_v63 = vsub.f32 %v1401_v29, %v1481_v62  ;;  %v4975_v62 = vld [vmem:[#allocation13 + $0x38] sm:$0xff]  }
 0x3c4   : > { %v6082_v1 = vpop.eup %5052 }
 0x3c5   : > { %v1507_v2 = vmul.f32 1.442695, %v1495_v63  ;;  %v1521_v3 = vsel %vm1236_vm1, %v6082_v1, 0.0  ;;  %v4976_v63 = vld [vmem:[#allocation13 + $0x30] sm:$0xff]  }
 0x3c6   : > { %v1484_v4 = vpop.xlane.xlu0 %1483  ;;  %1522 = vadd.xlane.f32.xlu1 %v1521_v3  ;;  %v4979_v3 = vld [vmem:[#allocation13 + $0x18] sm:$0xff]  }
 0x3c7   : > { %5056 = vpow2.f32 %v1507_v2  ;;  %v1496_v5 = vsub.f32 %v1404_v33, %v1484_v4  ;;  %v4978_v2 = vld [vmem:[#allocation13 + $0x20] sm:$0xff]   ;;  %v4980_v4 = vld [vmem:[#allocation13 + $0x10] sm:$0xff]  }
 0x3c8   : > { %v6086_v6 = vpop.eup %5054 }
 0x3c9   : > { %v1509_v7 = vmul.f32 1.442695, %v1496_v5  ;;  %v1524_v8 = vsel %vm1236_vm1, %v6086_v6, 0.0 }
 0x3ca   : > { %1525 = vadd.xlane.f32.xlu0 %v1524_v8 }
 0x3cb   : > { %5058 = vpow2.f32 %v1509_v7 }
 0x3d2   : > { %v1487_v10 = vpop.xlane.xlu1 %1486 }
 0x3d3   : > { %v1497_v12 = vsub.f32 %v1461_v38, %v1487_v10 }
 0x3d4   : > { %v6093_v13 = vpop.eup %5056 }
 0x3d5   : > { %v1511_v14 = vmul.f32 1.442695, %v1497_v12  ;;  %v1527_v15 = vsel %vm1236_vm1, %v6093_v13, 0.0 }
 0x3d6   : > { %1528 = vadd.xlane.f32.xlu1 %v1527_v15  ;;  %v1490_v16 = vpop.xlane.xlu0 %1489 }
 0x3d7   : > { %5060 = vpow2.f32 %v1511_v14  ;;  %v1498_v18 = vsub.f32 %v1464_v42, %v1490_v16 }
 0x3d8   : > { %v5059_v21 = vpop.eup %5058 }
 0x3d9   : > { %v1513_v19 = vmul.f32 1.442695, %v1498_v18  ;;  %v1530_v20 = vsel %vm1236_vm1, %v5059_v21, 0.0 }
 0x3da   : > { %1531 = vadd.xlane.f32.xlu0 %v1530_v20 }
 0x3db   : > { %5062 = vpow2.f32 %v1513_v19 }
 0x3e4   : > { %v5061_v23 = vpop.eup %5060 }
 0x3e5   : > { %v1533_v24 = vsel %vm1236_vm1, %v5061_v23, 0.0 }
 0x3e6   : > { %1534 = vadd.xlane.f32.xlu1 %v1533_v24 }
 0x3e8   : > { %v5063_v25 = vpop.eup %5062 }
 0x3e9   : > { %v1536_v26 = vsel %vm1236_vm1, %v5063_v25, 0.0 }
 0x3ea   : > { %1537 = vadd.xlane.f32.xlu0 %v1536_v26 }
 0x43f   : > { %v1517_v27 = vpop.xlane.xlu1 %1516 }
 0x440   : > { %5064 = vrcp.f32 %v1517_v27 }
 0x443   : > { %v1520_v29 = vpop.xlane.xlu0 %1519 }
 0x444   : > { %5066 = vrcp.f32 %v1520_v29 }
 0x44d   : > { %v5065_v30 = vpop.eup %5064 }
 0x44e   : > { %v1547_v33 = vmul.f32 %v5065_v30, %v6077_v54 }
 0x44f   : > { %v1523_v31 = vpop.xlane.xlu1 %1522 }
 0x450   : > { %5068 = vrcp.f32 %v1523_v31 }
 0x451   : > { %v5067_v32 = vpop.eup %5066 }
 0x452   : > { %v1548_v34 = vmul.f32 %v5067_v32, %v5051_v59 }
 0x453   : > { %v1526_v36 = vpop.xlane.xlu0 %1525 }
 0x454   : > { %5070 = vrcp.f32 %v1526_v36  ;;  %v1555_v38 = vpack.c.bf16 %v1548_v34, %v1547_v33 }
 0x456   : > { %4607 = vmatmul.mubr.msk.bf16.vlgmr.msra.gmra.mxu0 %vm1236_vm1, %v1555_v38 }
 0x457   : > { %4619 = vmatpush3.bf16.msra.mxu0 %v4971_v37  ;;  %4622 = vmatprep.mubr.msk.bf16.mxu0 %vm5533_vm0, %v5532_v0 }
 0x458   : > { %4620 = vmatprep.subr.bf16.mxu0 %v5532_v0 }
 0x45b   : > { %4621 = vmatpush3.bf16.msra.mxu0 %v4972_v39 }
 0x45c   : > { %4634 = vmatprep.subr.bf16.mxu0 %v5532_v0 }
 0x45d   : > { %v5069_v40 = vpop.eup %5068 }
 0x45e   : > { %v1549_v43 = vmul.f32 %v5069_v40, %v6082_v1  ;;  %v4977_v1 = vld [vmem:[#allocation13 + $0x28] sm:$0xff]  }
 0x45f   : > { %v1529_v41 = vpop.xlane.xlu1 %1528 }
 0x460   : > { %5072 = vrcp.f32 %v1529_v41 }
 0x461   : > { %v5071_v42 = vpop.eup %5070 }
 0x462   : > { %v1550_v44 = vmul.f32 %v5071_v42, %v6086_v6 }
 0x463   : > { %v1532_v45 = vpop.xlane.xlu0 %1531 }
 0x464   : > { %5074 = vrcp.f32 %v1532_v45  ;;  %v1556_v48 = vpack.c.bf16 %v1550_v44, %v1549_v43 }
 0x466   : > { %4615 = vmatmul.mubr.msk.bf16.vlgmr.msra.gmra.mxu1 %vm1236_vm1, %v1556_v48 }
 0x467   : > { %4627 = vmatpush3.bf16.msra.mxu1 %v4973_v47  ;;  %4630 = vmatprep.mubr.msk.bf16.mxu1 %vm5533_vm0, %v5532_v0 }
 0x468   : > { %4628 = vmatprep.subr.bf16.mxu1 %v5532_v0 }
 0x46b   : > { %4629 = vmatpush3.bf16.msra.mxu1 %v4974_v49 }
 0x46c   : > { %4654 = vmatprep.subr.bf16.mxu1 %v5532_v0 }
 0x46d   : > { %v5073_v50 = vpop.eup %5072 }
 0x46e   : > { %v1551_v53 = vmul.f32 %v5073_v50, %v6093_v13 }
 0x46f   : > { %v1535_v51 = vpop.xlane.xlu1 %1534 }
 0x470   : > { %5076 = vrcp.f32 %v1535_v51 }
 0x471   : > { %v5075_v52 = vpop.eup %5074 }
 0x472   : > { %v1552_v54 = vmul.f32 %v5075_v52, %v5059_v21 }
 0x473   : > { %v1538_v55 = vpop.xlane.xlu0 %1537 }
 0x474   : > { %5078 = vrcp.f32 %v1538_v55  ;;  %v1557_v56 = vpack.c.bf16 %v1552_v54, %v1551_v53 }
 0x476   : > { %4623 = vmatmul.mubr.msk.bf16.vlgmr.msra.gmra.mxu0 %vm1236_vm1, %v1557_v56 }
 0x477   : > { %4650 = vmatprep.mubr.msk.bf16.mxu0 %vm5533_vm0, %v5532_v0  ;;  %4635 = vmatpush3.bf16.msra.mxu0 %v4975_v62 }
 0x478   : > { %4636 = vmatprep.subr.bf16.mxu0 %v5532_v0 }
 0x47b   : > { %4637 = vmatpush3.bf16.msra.mxu0 %v4976_v63 }
 0x47c   : > { %4638 = vmatprep.subr.bf16.mxu0 %v5532_v0 }
 0x47d   : > { %v5077_v57 = vpop.eup %5076 }
 0x47e   : > { %v1553_v59 = vmul.f32 %v5077_v57, %v5061_v23 }
 0x47f   : > { %4639 = vmatpush3.bf16.msra.mxu0 %v4977_v1 }
 0x480   : > { %4640 = vmatprep.subr.bf16.mxu0 %v5532_v0 }
 0x481   : > { %v5079_v58 = vpop.eup %5078 }
 0x482   : > { %v1554_v60 = vmul.f32 %v5079_v58, %v5063_v25 }
 0x483   : > { %4641 = vmatpush3.bf16.msra.mxu0 %v4978_v2 }
 0x484   : > { %v1558_v61 = vpack.c.bf16 %v1554_v60, %v1553_v59  ;;  %4642 = vmatprep.subr.bf16.mxu0 %v5532_v0 }
 0x486   : > { %4631 = vmatmul.mubr.msk.bf16.vlgmr.msra.gmra.mxu1 %vm1236_vm1, %v1558_v61 }
 0x487   : > { %4670 = vmatprep.mubr.msk.bf16.mxu1 %vm5533_vm0, %v5532_v0  ;;  %4643 = vmatpush3.bf16.msra.mxu0 %v4979_v3 }
 0x488   : > { %4644 = vmatprep.subr.bf16.mxu0 %v5532_v0 }
 0x48b   : > { %4645 = vmatpush3.bf16.msra.mxu0 %v4980_v4 }
 0x48c   : > { %4646 = vmatprep.subr.bf16.mxu0 %v5532_v0 }
 0x516   : > { %v1608_v5 = vpop.f32.mrf.mxu0 }
 0x518   : > { %v4608_v6 = vpop.f32.mrf.mxu0 }
 0x51a   : > { %v1611_v7 = vpop.f32.mrf.mxu0 }
 0x51c   : > { %v4609_v8 = vpop.f32.mrf.mxu0 }
 0x526   : > { %v1664_v9 = vpop.f32.mrf.mxu1 }
 0x528   : > { %v4616_v10 = vpop.f32.mrf.mxu1 }
 0x52a   : > { %v1667_v11 = vpop.f32.mrf.mxu1 }
 0x52c   : > { %v4617_v12 = vpop.f32.mrf.mxu1 }
 0x536   : > { %v1720_v13 = vpop.f32.mrf.mxu0 }
 0x537   : > { %v1783_v17 = vcombine.low %v1608_v5, %v1720_v13  ;;  %v1784_v18 = vcombine.high %v1608_v5, %v1720_v13  ;;  %v4981_v5 = vld [vmem:[#allocation13 + $0x8] sm:$0xff]  }
 0x538   : > { %v4624_v14 = vpop.f32.mrf.mxu0  ;;  %4647 = vmatpush3.bf16.msra.mxu0 %v4981_v5 }
 0x539   : > { %v1791_v23 = vrot.slane %v1783_v17, %v5998_v35  ;;  %v1798_v24 = vrot.slane %v1784_v18, %v5998_v35  ;;  %4648 = vmatprep.subr.bf16.mxu0 %v5532_v0 }
 0x53a   : > { %v1723_v15 = vpop.f32.mrf.mxu0 }
 0x53b   : > { %v1851_v27 = vcombine.low %v1611_v7, %v1723_v15  ;;  %v1852_v29 = vcombine.high %v1611_v7, %v1723_v15 }
 0x53c   : > { %v4625_v16 = vpop.f32.mrf.mxu0 }
 0x53d   : > { %v1859_v43 = vrot.slane %v1851_v27, %v5998_v35  ;;  %v1866_v44 = vrot.slane %v1852_v29, %v5998_v35 }
 0x546   : > { %v1776_v21 = vpop.f32.mrf.mxu1 }
 0x547   : > { %v1799_v19 = vcombine.low %v1664_v9, %v1776_v21  ;;  %v1800_v20 = vcombine.high %v1664_v9, %v1776_v21  ;;  %v4982_v21 = vld [vmem:[#allocation13] sm:$0xff]  }
 0x548   : > { %v4632_v22 = vpop.f32.mrf.mxu1  ;;  %4649 = vmatpush3.bf16.msra.mxu0 %v4982_v21  ;;  %v4988_v21 = vld [vmem:[#allocation11 + $0x50] sm:$0xff]  }
 0x549   : > { %v1807_v25 = vrot.slane %v1799_v19, %v5998_v35  ;;  %v1814_v26 = vrot.slane %v1800_v20, %v5998_v35  ;;  %4674 = vmatprep.subr.bf16.mxu0 %v5532_v0 }
 0x54a   : > { %v1779_v30 = vpop.f32.mrf.mxu1 }
 0x54b   : > { %v1815_v31 = vcombine.low %v1791_v23, %v1807_v25  ;;  %v1816_v32 = vcombine.high %v1791_v23, %v1807_v25  ;;  %v1831_v33 = vcombine.low %v1798_v24, %v1814_v26  ;;  %v1832_v34 = vcombine.high %v1798_v24, %v1814_v26 }
 0x54c   : > { %v1867_v36 = vcombine.low %v1667_v11, %v1779_v30  ;;  %v1868_v37 = vcombine.high %v1667_v11, %v1779_v30  ;;  %v4633_v38 = vpop.f32.mrf.mxu1 }
 0x54d   : > { %v1823_v39 = vrot.slane %v1815_v31, %v6003_v46  ;;  %v1830_v40 = vrot.slane %v1816_v32, %v6003_v46  ;;  %v1839_v41 = vrot.slane %v1831_v33, %v6003_v46  ;;  %v1846_v42 = vrot.slane %v1832_v34, %v6003_v46 }
 0x54e   : > { %v1875_v45 = vrot.slane %v1867_v36, %v5998_v35  ;;  %v1882_v47 = vrot.slane %v1868_v37, %v5998_v35 }
 0x54f   : > { %v1919_v48 = vcombine.low %v1823_v39, %v1830_v40  ;;  %v4342_v49 = vcombine.high %v1823_v39, %v1830_v40  ;;  %v1935_v50 = vcombine.low %v1839_v41, %v1846_v42  ;;  %v4343_v51 = vcombine.high %v1839_v41, %v1846_v42 }
 0x550   : > { %v1883_v52 = vcombine.low %v1859_v43, %v1875_v45  ;;  %v1884_v53 = vcombine.high %v1859_v43, %v1875_v45  ;;  %v1899_v54 = vcombine.low %v1866_v44, %v1882_v47  ;;  %v1900_v55 = vcombine.high %v1866_v44, %v1882_v47 }
 0x551   : > { %v1926_v56 = vrot.slane %v1919_v48, %v5998_v35  ;;  %v1934_v57 = vrot.slane %v4342_v49, %v5998_v35  ;;  %v1942_v58 = vrot.slane %v1935_v50, %v5998_v35  ;;  %v1950_v59 = vrot.slane %v4343_v51, %v5998_v35 }
 0x552   : > { %v1891_v60 = vrot.slane %v1883_v52, %v6003_v46  ;;  %v1898_v61 = vrot.slane %v1884_v53, %v6003_v46  ;;  %v1907_v62 = vrot.slane %v1899_v54, %v6003_v46  ;;  %v1914_v63 = vrot.slane %v1900_v55, %v6003_v46 }
 0x553   : > { %v1952_v1 = vcombine.high %v1926_v56, %v1934_v57  ;;  %v1968_v2 = vcombine.high %v1942_v58, %v1950_v59  ;;  %v1951_v3 = vcombine.low %v1926_v56, %v1934_v57  ;;  %v1967_v4 = vcombine.low %v1942_v58, %v1950_v59  ;;  %v4346_v57 = vld [vmem:[%s6576_s19] ss:$0 sm:$0xff]  ;;  %s6583_s19 = sld [smem:[#allocation50_spill]] }
 0x554   : > { %v1987_v6 = vcombine.low %v1891_v60, %v1898_v61  ;;  %v4344_v7 = vcombine.high %v1891_v60, %v1898_v61  ;;  %v2003_v8 = vcombine.low %v1907_v62, %v1914_v63  ;;  %v4345_v9 = vcombine.high %v1907_v62, %v1914_v63  ;;  %v5136_v58 = vld [vmem:[%s5930_s22] sm:$0xff]   ;;  %s6584_s22 = sld [smem:[#allocation30_spill]] }
 0x555   : > { %v1959_v10 = vrot.slane %v1951_v3, %v6003_v46  ;;  %v1975_v11 = vrot.slane %v1967_v4, %v6003_v46  ;;  %v1966_v16 = vrot.slane %v1952_v1, %v6003_v46  ;;  %v1982_v17 = vrot.slane %v1968_v2, %v6003_v46 }
 0x556   : > { %v1994_v12 = vrot.slane %v1987_v6, %v5998_v35  ;;  %v2002_v13 = vrot.slane %v4344_v7, %v5998_v35  ;;  %v2010_v14 = vrot.slane %v2003_v8, %v5998_v35  ;;  %v2018_v15 = vrot.slane %v4345_v9, %v5998_v35 }
 0x557   : > { %v1983_v18 = vcombine.low %v1959_v10, %v1975_v11  ;;  %v1985_v29 = vcombine.low %v1966_v16, %v1982_v17  ;;  %v1984_v31 = vcombine.high %v1959_v10, %v1975_v11  ;;  %v1986_v38 = vcombine.high %v1966_v16, %v1982_v17  ;;  %v4985_v16 = vld [vmem:[#allocation11 + $0x68] sm:$0xff]   ;;  %v4986_v17 = vld [vmem:[#allocation11 + $0x60] sm:$0xff]  }
 0x558   : > { %v2020_v19 = vcombine.high %v1994_v12, %v2002_v13  ;;  %v2036_v20 = vcombine.high %v2010_v14, %v2018_v15  ;;  %v2019_v22 = vcombine.low %v1994_v12, %v2002_v13  ;;  %v2035_v23 = vcombine.low %v2010_v14, %v2018_v15  ;;  %v4983_v14 = vld [vmem:[#allocation11 + $0x78] sm:$0xff]   ;;  %v4984_v15 = vld [vmem:[#allocation11 + $0x70] sm:$0xff]  }
 0x559   : > { %v748_v59 = vunpack.c.l.bf16 %v5136_v58  ;;  %v749_v1 = vunpack.c.h.bf16 %v5136_v58  ;;  %4655 = vmatpush3.bf16.msra.mxu1 %v4983_v14 }
 0x55a   : > { %v2034_v24 = vrot.slane %v2020_v19, %v6003_v46  ;;  %v2050_v25 = vrot.slane %v2036_v20, %v6003_v46  ;;  %v2027_v26 = vrot.slane %v2019_v22, %v6003_v46  ;;  %v2043_v27 = vrot.slane %v2035_v23, %v6003_v46  ;;  %4656 = vmatprep.subr.bf16.mxu1 %v5532_v0  ;;  %v4989_v19 = vld [vmem:[#allocation11 + $0x48] sm:$0xff]   ;;  %v4990_v20 = vld [vmem:[#allocation11 + $0x40] sm:$0xff]   ;;  %s4444_s21 = sshll.u32 %s6584_s22, 2 }
 0x55b   : > { %s4051_s6 = sadd.s32 %s4444_s21, %s4443_s14 }
 0x55c   : > { %v2053_v30 = vcombine.low %v2034_v24, %v2050_v25  ;;  %v2052_v32 = vcombine.high %v2027_v26, %v2043_v27  ;;  %v2051_v33 = vcombine.low %v2027_v26, %v2043_v27  ;;  %v2054_v37 = vcombine.high %v2034_v24, %v2050_v25 }
 0x55d   : > { %4657 = vmatpush3.bf16.msra.mxu1 %v4984_v15 }
 0x55e   : > { %v4925_v34 = vpack.i.bf16 %v2053_v30, %v1985_v29  ;;  %v4920_v36 = vpack.i.bf16 %v2052_v32, %v1984_v31  ;;  %v4930_v39 = vpack.i.bf16 %v2054_v37, %v1986_v38  ;;  %4658 = vmatprep.subr.bf16.mxu1 %v5532_v0 }
 0x560   : > { %4926 = vrot.lane.b32.xlu0 %v4925_v34, %s5534_s17  ;;  %4921 = vrot.lane.b32.xlu1 %v4920_v36, %s5536_s1 }
 0x561   : > { %4659 = vmatpush3.bf16.msra.mxu1 %v4985_v16 }
 0x562   : > { %4660 = vmatprep.subr.bf16.mxu1 %v5532_v0 }
 0x564   : > { %4931 = vrot.lane.b32.xlu1 %v4930_v39, %s5535_s30 }
 0x565   : > { %4661 = vmatpush3.bf16.msra.mxu1 %v4986_v17 }
 0x566   : > { %4662 = vmatprep.subr.bf16.mxu1 %v5532_v0 }
 0x5d2   : > { %v4927_v40 = vpop.permute.xlu0 %4926  ;;  %v4922_v41 = vpop.permute.xlu1 %4921 }
 0x5d3   : > { %v4924_v42 = vunpack.i.h.bf16 %v4922_v41  ;;  %v4923_v43 = vunpack.i.l.bf16 %v4922_v41  ;;  %v4929_v44 = vunpack.i.h.bf16 %v4927_v40  ;;  %v4928_v45 = vunpack.i.l.bf16 %v4927_v40  ;;  %v4355_v40 = vld [vmem:[%s6578_s18] ss:$0 sm:$0xff] }
 0x5d5   : > { %v2079_v47 = vsel %vm1236_vm1, %v1983_v18, %v4923_v43  ;;  %v2080_v48 = vsel %vm1236_vm1, %v2051_v33, %v4924_v42  ;;  %v4987_v18 = vld [vmem:[#allocation11 + $0x58] sm:$0xff]  }
 0x5d6   : > { %v4932_v49 = vpop.permute.xlu1 %4931  ;;  %v2082_v52 = vsel %vm2081_vm4, %v2079_v47, %v4928_v45  ;;  %v2083_v53 = vsel %vm2081_vm4, %v2080_v48, %v4929_v44  ;;  %4663 = vmatpush3.bf16.msra.mxu1 %v4987_v18  ;;  %v4356_v47 = vld [vmem:[%s6580_s23] ss:$0 sm:$0xff]  ;;  %s4302_s23 = sshll.u32 %s5926_s25, 4 }
 0x5d7   : > { %v4934_v50 = vunpack.i.h.bf16 %v4932_v49  ;;  %v4933_v51 = vunpack.i.l.bf16 %v4932_v49  ;;  %4664 = vmatprep.subr.bf16.mxu1 %v5532_v0  ;;  %s742_s12 = scalar_lea.vmem [#allocation17], %s4302_s23 }
 0x5d8   : > { %s4054_s9 = sshll.u32 %s742_s12, 4  ;;  %s6395_s9 = int_to_ptr.vmem [resolvable:$true] %s4054_s9 }
 0x5d9   : > { %v2085_v54 = vsel %vm2084_vm5, %v2082_v52, %v4933_v51  ;;  %v2086_v55 = vsel %vm2084_vm5, %v2083_v53, %v4934_v50  ;;  %v4359_v52 = vld [vmem:[%s6574_s5 + $0x1] ss:$0 sm:$0xff]  ;;  %s5381_s20 = scalar_lea.vmem %s6395_s9, 256 }
 0x5da   : > { %v2087_v56 = vpack.c.bf16 %v2086_v55, %v2085_v54  ;;  %4665 = vmatpush3.bf16.msra.mxu1 %v4988_v21  ;;  %p5382_p8 = scmp.ne.s32.totalorder %s6395_s9, %s5381_s20 }
 0x5db   : > { %4666 = vmatprep.subr.bf16.mxu1 %v5532_v0 }
 0x5dc   : > { %4651 = vmatmul.mubr.bf16.vlgmr.msra.gmra.mxu0 %v2087_v56 }
 0x5dd   : > { %4676 = vmatprep.mubr.msk.bf16.mxu0 %vm5533_vm0, %v5532_v0 }
 0x5de   : > { %4667 = vmatpush3.bf16.msra.mxu1 %v4989_v19 }
 0x5df   : > { %4668 = vmatprep.subr.bf16.mxu1 %v5532_v0 }
 0x5e2   : > { %4669 = vmatpush3.bf16.msra.mxu1 %v4990_v20 }
 0x5e3   : > { %4680 = vmatprep.subr.bf16.mxu1 %v5532_v0 }
 0x69c   : > { %v2176_v60 = vpop.f32.mrf.mxu0 }
 0x69d   : > { %v2177_v61 = vadd.f32 %v4346_v57, %v2176_v60  ;;  %v4992_v60 = vld [vmem:[%s5946_s11 + $0x8] sm:$0xff]  }
 0x69e   : > { %v4652_v62 = vpop.f32.mrf.mxu0 }
 0x69f   : > { %v2183_v63 = vadd.f32 %v2177_v61, %v748_v59  ;;  %v4991_v59 = vld [vmem:[%s5946_s11] sm:$0xff]   ;;  %v2748_v62 = vsel %vm1236_vm1, %v4992_v60, 0 }
 0x6a0   : > { %v2179_v2 = vpop.f32.mrf.mxu0  ;;  %v2696_v61 = vsel %vm1236_vm1, %v4991_v59, 0 }
 0x6a1   : > { %v2180_v3 = vadd.f32 %v4346_v57, %v2179_v2  ;;  %2187 = vadd.xlane.f32.xlu1 %v2183_v63  ;;  %4675 = vmatpush3.bf16.xpose.msra.mxu0 %v2696_v61 }
 0x6a2   : > { %v4653_v4 = vpop.f32.mrf.mxu0  ;;  %4686 = vmatprep.subr.bf16.mxu0 %v5532_v0 }
 0x6a3   : > { %v2184_v5 = vadd.f32 %v2180_v3, %v749_v1 }
 0x6a5   : > { %2189 = vadd.xlane.f32.xlu0 %v2184_v5 }
 0x72a   : > { %v2188_v6 = vpop.xlane.xlu1 %2187 }
 0x72b   : > { %v2192_v7 = vmul.f32 0.0078125, %v2188_v6 }
 0x72d   : > { %v2194_v8 = vsub.f32 %v2183_v63, %v2192_v7 }
 0x72e   : > { %v2190_v9 = vpop.xlane.xlu0 %2189 }
 0x72f   : > { %v2193_v10 = vmul.f32 0.0078125, %v2190_v9  ;;  %v2196_v11 = vmul.f32 %v2194_v8, %v2194_v8  ;;  %v2211_v42 = vmul.f32 %v4355_v40, %v2194_v8 }
 0x731   : > { %v2195_v12 = vsub.f32 %v2184_v5, %v2193_v10  ;;  %2198 = vadd.xlane.f32.xlu0 %v2196_v11 }
 0x733   : > { %v2197_v13 = vmul.f32 %v2195_v12, %v2195_v12  ;;  %v2212_v43 = vmul.f32 %v4355_v40, %v2195_v12 }
 0x735   : > { %2200 = vadd.xlane.f32.xlu1 %v2197_v13 }
 0x7ba   : > { %v2199_v22 = vpop.xlane.xlu0 %2198 }
 0x7bb   : > { %v2203_v23 = vmul.f32 0.007874016, %v2199_v22 }
 0x7bd   : > { %5080 = vrsqrt.f32 %v2203_v23  ;;  %vm2215_vm6 = vcmp.eq.f32.partialorder %v2203_v23, inf  ;;  %v2218_v29 = vand.u32 2147483648, %v2203_v23  ;;  %vm2217_vm7 = vcmp.eq.f32.partialorder %v2203_v23, 0.0 }
 0x7be   : > { %v2201_v24 = vpop.xlane.xlu1 %2200 }
 0x7bf   : > { %v2204_v25 = vmul.f32 0.007874016, %v2201_v24 }
 0x7c1   : > { %5082 = vrsqrt.f32 %v2204_v25  ;;  %vm2222_vm8 = vcmp.eq.f32.partialorder %v2204_v25, inf  ;;  %v2225_v36 = vand.u32 2147483648, %v2204_v25  ;;  %vm2224_vm9 = vcmp.eq.f32.partialorder %v2204_v25, 0.0 }
 0x7ca   : > { %v5081_v26 = vpop.eup %5080 }
 0x7cb   : > { %v2214_v27 = vmul.f32 %v5081_v26, %v2203_v23 }
 0x7cd   : > { %v2216_v30 = vsel %vm2215_vm6, %v2203_v23, %v2214_v27 }
 0x7ce   : > { %v5083_v31 = vpop.eup %5082  ;;  %v2219_v32 = vsel %vm2217_vm7, %v2218_v29, %v2216_v30 }
 0x7cf   : > { %v2227_v33 = vadd.f32 1e-06, %v2219_v32  ;;  %v2221_v34 = vmul.f32 %v5083_v31, %v2204_v25 }
 0x7d1   : > { %5084 = vrcp.f32 %v2227_v33  ;;  %v2223_v37 = vsel %vm2222_vm8, %v2204_v25, %v2221_v34 }
 0x7d2   : > { %v2226_v38 = vsel %vm2224_vm9, %v2225_v36, %v2223_v37 }
 0x7d3   : > { %v2228_v39 = vadd.f32 1e-06, %v2226_v38 }
 0x7d5   : > { %5086 = vrcp.f32 %v2228_v39 }
 0x7de   : > { %v5085_v41 = vpop.eup %5084 }
 0x7df   : > { %v2230_v44 = vmul.f32 %v5085_v41, %v2211_v42 }
 0x7e1   : > { %v6198_v49 = vadd.f32 %v4356_v47, %v2230_v44 }
 0x7e2   : > { %v5087_v45 = vpop.eup %5086 }
 0x7e3   : > { %v2232_v48 = vmul.f32 %v5087_v45, %v2212_v43 }
 0x7e5   : > { %v6200_v50 = vadd.f32 %v4356_v47, %v2232_v48 }
 0x7e7   : > { %v2241_v51 = vpack.c.bf16 %v6200_v50, %v6198_v49 }
 0x7e9   : > { %4671 = vmatmul.mubr.bf16.vlgmr.msra.gmra.mxu1 %v2241_v51 }
 0x7ea   : > { %4682 = vmatprep.mubr.msk.bf16.mxu1 %vm5533_vm0, %v5532_v0  ;;  %4681 = vmatpush3.bf16.xpose.msra.mxu1 %v2748_v62 }
 0x7eb   : > { %4692 = vmatprep.subr.bf16.mxu1 %v5532_v0 }
 0x8a9   : > { %v2384_v53 = vpop.f32.mrf.mxu1 }
 0x8aa   : > { %v2385_v54 = vadd.f32 %v4359_v52, %v2384_v53 }
 0x8ab   : > { %v4672_v55 = vpop.f32.mrf.mxu1 }
 0x8ac   : > { %2399 = vrot.lane.b32.xlu1 %v2385_v54, %s5534_s17  ;;  %2393 = vrot.lane.b32.xlu0 %v2385_v54, %s5535_s30 }
 0x8ad   : > { %v2387_v56 = vpop.f32.mrf.mxu1 }
 0x8ae   : > { %v2388_v57 = vadd.f32 %v4359_v52, %v2387_v56 }
 0x8af   : > { %v4673_v58 = vpop.f32.mrf.mxu1 }
 0x8b0   : > { %2401 = vrot.lane.b32.xlu0 %v2388_v57, %s5534_s17  ;;  %2395 = vrot.lane.b32.xlu1 %v2388_v57, %s5535_s30 }
 0x8b4   : > { %2407 = vrot.lane.b32.xlu0 %v2388_v57, %s5536_s1  ;;  %2405 = vrot.lane.b32.xlu1 %v2385_v54, %s5536_s1 }
 0x91e   : > { %v2400_v63 = vpop.permute.xlu1 %2399  ;;  %v2394_v1 = vpop.permute.xlu0 %2393 }
 0x91f   : > { %v2411_v6 = vcombine.low %v2385_v54, %v2400_v63  ;;  %v2412_v7 = vcombine.high %v2385_v54, %v2400_v63 }
 0x921   : > { %v2419_v19 = vrot.slane %v2411_v6, %v5998_v35  ;;  %v2426_v20 = vrot.slane %v2412_v7, %v5998_v35 }
 0x922   : > { %v2402_v2 = vpop.permute.xlu0 %2401  ;;  %v2396_v3 = vpop.permute.xlu1 %2395 }
 0x923   : > { %v2479_v4 = vcombine.low %v2388_v57, %v2402_v2  ;;  %v2480_v5 = vcombine.high %v2388_v57, %v2402_v2 }
 0x925   : > { %v2487_v14 = vrot.slane %v2479_v4, %v5998_v35  ;;  %v2494_v15 = vrot.slane %v2480_v5, %v5998_v35  ;;  %v4993_v4 = vld [vmem:[%s5946_s11 + $0x10] sm:$0xff]   ;;  %v4994_v5 = vld [vmem:[%s5946_s11 + $0x18] sm:$0xff]   ;;  %s6585_s11 = sld [smem:[#allocation35_spill]] }
 0x926   : > { %v2408_v8 = vpop.permute.xlu0 %2407  ;;  %v2406_v9 = vpop.permute.xlu1 %2405 }
 0x927   : > { %v2495_v10 = vcombine.low %v2396_v3, %v2408_v8  ;;  %v2496_v11 = vcombine.high %v2396_v3, %v2408_v8  ;;  %v2427_v12 = vcombine.low %v2394_v1, %v2406_v9  ;;  %v2428_v13 = vcombine.high %v2394_v1, %v2406_v9 }
 0x929   : > { %v2503_v16 = vrot.slane %v2495_v10, %v5998_v35  ;;  %v2510_v17 = vrot.slane %v2496_v11, %v5998_v35  ;;  %v2435_v18 = vrot.slane %v2427_v12, %v5998_v35  ;;  %v2442_v21 = vrot.slane %v2428_v13, %v5998_v35 }
 0x92b   : > { %v2511_v22 = vcombine.low %v2487_v14, %v2503_v16  ;;  %v2512_v23 = vcombine.high %v2487_v14, %v2503_v16  ;;  %v2527_v24 = vcombine.low %v2494_v15, %v2510_v17  ;;  %v2528_v25 = vcombine.high %v2494_v15, %v2510_v17  ;;  %p6587_p1 = scmp.ne.s32.totalorder %s6585_s11, 0 }
 0x92c   : > { %v2443_v26 = vcombine.low %v2419_v19, %v2435_v18  ;;  %v2444_v27 = vcombine.high %v2419_v19, %v2435_v18  ;;  %v2459_v29 = vcombine.low %v2426_v20, %v2442_v21  ;;  %v2460_v30 = vcombine.high %v2426_v20, %v2442_v21 }
 0x92d   : > { %v2519_v31 = vrot.slane %v2511_v22, %v6003_v46  ;;  %v2526_v32 = vrot.slane %v2512_v23, %v6003_v46  ;;  %v2535_v33 = vrot.slane %v2527_v24, %v6003_v46  ;;  %v2542_v34 = vrot.slane %v2528_v25, %v6003_v46  ;;  %p5383_p2 = pnand %p5382_p8, %p6587_p1 }
 0x92e   : > { %v2451_v36 = vrot.slane %v2443_v26, %v6003_v46  ;;  %v2458_v37 = vrot.slane %v2444_v27, %v6003_v46  ;;  %v2467_v38 = vrot.slane %v2459_v29, %v6003_v46  ;;  %v2474_v39 = vrot.slane %v2460_v30, %v6003_v46 }
 0x92f   : > { %v2615_v40 = vcombine.low %v2519_v31, %v2526_v32  ;;  %v4370_v41 = vcombine.high %v2519_v31, %v2526_v32  ;;  %v2631_v42 = vcombine.low %v2535_v33, %v2542_v34  ;;  %v4371_v43 = vcombine.high %v2535_v33, %v2542_v34  ;;  %p5384_p6 = pneg %p5383_p2 }
 0x930   : > { %v2547_v44 = vcombine.low %v2451_v36, %v2458_v37  ;;  %v4368_v45 = vcombine.high %v2451_v36, %v2458_v37  ;;  %v2563_v47 = vcombine.low %v2467_v38, %v2474_v39  ;;  %v4369_v48 = vcombine.high %v2467_v38, %v2474_v39 }
 0x931   : > { %v2622_v51 = vrot.slane %v2615_v40, %v5998_v35  ;;  %v2630_v52 = vrot.slane %v4370_v41, %v5998_v35  ;;  %v2638_v53 = vrot.slane %v2631_v42, %v5998_v35  ;;  %v2646_v54 = vrot.slane %v4371_v43, %v5998_v35 }
 0x932   : > { %v2554_v55 = vrot.slane %v2547_v44, %v5998_v35  ;;  %v2562_v56 = vrot.slane %v4368_v45, %v5998_v35  ;;  %v2570_v57 = vrot.slane %v2563_v47, %v5998_v35  ;;  %v2578_v58 = vrot.slane %v4369_v48, %v5998_v35 }
 0x933   : > { %v2647_v59 = vcombine.low %v2622_v51, %v2630_v52  ;;  %v2663_v60 = vcombine.low %v2638_v53, %v2646_v54  ;;  %v2648_v63 = vcombine.high %v2622_v51, %v2630_v52  ;;  %v2664_v2 = vcombine.high %v2638_v53, %v2646_v54 }
 0x934   : > { %v2579_v61 = vcombine.low %v2554_v55, %v2562_v56  ;;  %v2595_v62 = vcombine.low %v2570_v57, %v2578_v58  ;;  %v2580_v6 = vcombine.high %v2554_v55, %v2562_v56  ;;  %v2596_v8 = vcombine.high %v2570_v57, %v2578_v58 }
 0x935   : > { %v2655_v1 = vrot.slane %v2647_v59, %v6003_v46  ;;  %v2671_v3 = vrot.slane %v2663_v60, %v6003_v46  ;;  %v2662_v14 = vrot.slane %v2648_v63, %v6003_v46  ;;  %v2678_v15 = vrot.slane %v2664_v2, %v6003_v46 }
 0x936   : > { %v2587_v7 = vrot.slane %v2579_v61, %v6003_v46  ;;  %v2603_v9 = vrot.slane %v2595_v62, %v6003_v46  ;;  %v2800_v16 = vsel %vm1236_vm1, %v4993_v4, 0  ;;  %v2852_v17 = vsel %vm1236_vm1, %v4994_v5, 0 }
 0x937   : > { %v2679_v10 = vcombine.low %v2655_v1, %v2671_v3  ;;  %v2680_v11 = vcombine.high %v2655_v1, %v2671_v3  ;;  %v2594_v18 = vrot.slane %v2580_v6, %v6003_v46  ;;  %v2610_v21 = vrot.slane %v2596_v8, %v6003_v46 }
 0x938   : > { %v2611_v12 = vcombine.low %v2587_v7, %v2603_v9  ;;  %v2612_v13 = vcombine.high %v2587_v7, %v2603_v9  ;;  %v2681_v22 = vcombine.low %v2662_v14, %v2678_v15  ;;  %v2682_v25 = vcombine.high %v2662_v14, %v2678_v15 }
 0x939   : > { %v2613_v23 = vcombine.low %v2594_v18, %v2610_v21  ;;  %v2614_v24 = vcombine.high %v2594_v18, %v2610_v21 }
 0x93a   : > { %v2683_v19 = vpack.c.bf16 %v2679_v10, %v2611_v12  ;;  %v2684_v20 = vpack.c.bf16 %v2680_v11, %v2612_v13 }
 0x93b   : > { %v2685_v26 = vpack.c.bf16 %v2681_v22, %v2613_v23  ;;  %v2686_v27 = vpack.c.bf16 %v2682_v25, %v2614_v24 }
 0x93c   : > { %4677 = vmatmul.mubr.msk.bf16.vlgmr.msra.gmra.mxu0 %vm1236_vm1, %v2683_v19  ;;  %4683 = vmatmul.mubr.msk.bf16.vlgmr.msra.gmra.mxu1 %vm1236_vm1, %v2684_v20 }
 0x93d   : > { %4687 = vmatpush3.bf16.xpose.msra.mxu0 %v2800_v16  ;;  %4693 = vmatpush3.bf16.xpose.msra.mxu1 %v2852_v17 }
 0x93e   : > { %4688 = vmatprep.mubr.msk.bf16.mxu0 %vm5533_vm0, %v5532_v0  ;;  %4694 = vmatprep.mubr.msk.bf16.mxu1 %vm5533_vm0, %v5532_v0 }
 0x93f   : > { %4698 = vmatprep.subr.bf16.mxu0 %v5532_v0  ;;  %4704 = vmatprep.subr.bf16.mxu1 %v5532_v0 }
 0x944   : > { %4689 = vmatmul.mubr.msk.bf16.vlgmr.msra.gmra.mxu0 %vm1236_vm1, %v2685_v26  ;;  %4695 = vmatmul.mubr.msk.bf16.vlgmr.msra.gmra.mxu1 %vm1236_vm1, %v2686_v27 }
 0x945   : > { %4700 = vmatprep.mubr.msk.bf16.mxu0 %vm5533_vm0, %v5532_v0  ;;  %4706 = vmatprep.mubr.msk.bf16.mxu1 %vm5533_vm0, %v5532_v0 }
 0x9fc   : > { %v2732_v29 = vpop.f32.mrf.mxu0  ;;  %v2784_v30 = vpop.f32.mrf.mxu1 }
 0x9fd   : > { %v2896_v31 = vsel %vm2895_vm10, %v2732_v29, -inf  ;;  %v2902_v32 = vsel %vm2895_vm10, %v2784_v30, -inf }
 0x9fe   : > { %2897 = vmax.xlane.f32.xlu1 %v2896_v31  ;;  %v4678_v33 = vpop.f32.mrf.mxu0  ;;  %2903 = vmax.xlane.f32.xlu0 %v2902_v32  ;;  %v4684_v34 = vpop.f32.mrf.mxu1 }
 0xa00   : > { %v2735_v36 = vpop.f32.mrf.mxu0  ;;  %v2787_v37 = vpop.f32.mrf.mxu1 }
 0xa01   : > { %v2899_v38 = vsel %vm2895_vm10, %v2735_v36, -inf  ;;  %v2905_v39 = vsel %vm2895_vm10, %v2787_v37, -inf }
 0xa02   : > { %v4679_v40 = vpop.f32.mrf.mxu0  ;;  %2900 = vmax.xlane.f32.xlu0 %v2899_v38  ;;  %2906 = vmax.xlane.f32.xlu1 %v2905_v39  ;;  %v4685_v41 = vpop.f32.mrf.mxu1 }
 0xa04   : > { %v2836_v42 = vpop.f32.mrf.mxu0  ;;  %v2888_v43 = vpop.f32.mrf.mxu1 }
 0xa05   : > { %v2908_v44 = vsel %vm2895_vm10, %v2836_v42, -inf  ;;  %v2914_v53 = vsel %vm2895_vm10, %v2888_v43, -inf }
 0xa06   : > { %v4690_v45 = vpop.f32.mrf.mxu0  ;;  %2909 = vmax.xlane.f32.xlu0 %v2908_v44  ;;  %v4696_v47 = vpop.f32.mrf.mxu1 }
 0xa08   : > { %v2839_v48 = vpop.f32.mrf.mxu0  ;;  %v2891_v51 = vpop.f32.mrf.mxu1 }
 0xa09   : > { %v2911_v52 = vsel %vm2895_vm10, %v2839_v48, -inf  ;;  %v2917_v56 = vsel %vm2895_vm10, %v2891_v51, -inf }
 0xa0a   : > { %v4691_v54 = vpop.f32.mrf.mxu0  ;;  %2912 = vmax.xlane.f32.xlu1 %v2911_v52  ;;  %2915 = vmax.xlane.f32.xlu0 %v2914_v53  ;;  %v4697_v55 = vpop.f32.mrf.mxu1 }
 0xa0b   : > { %v4997_v54 = vld [vmem:[%s5952_s8 + $0x10] sm:$0xff]  }
 0xa0e   : > { %2918 = vmax.xlane.f32.xlu1 %v2917_v56 }
 0xa87   : > { %v2898_v57 = vpop.xlane.xlu1 %2897  ;;  %v2904_v58 = vpop.xlane.xlu0 %2903 }
 0xa88   : > { %v2920_v59 = vsub.f32 %v2732_v29, %v2898_v57  ;;  %v2922_v60 = vsub.f32 %v2784_v30, %v2904_v58 }
 0xa8a   : > { %v2928_v61 = vmul.f32 1.442695, %v2920_v59  ;;  %v2932_v62 = vmul.f32 1.442695, %v2922_v60  ;;  %v4998_v60 = vld [vmem:[%s5952_s8 + $0x18] sm:$0xff]  }
 0xa8b   : > { %v2901_v63 = vpop.xlane.xlu0 %2900  ;;  %v2907_v1 = vpop.xlane.xlu1 %2906 }
 0xa8c   : > { %5088 = vpow2.f32 %v2928_v61  ;;  %v2921_v2 = vsub.f32 %v2735_v36, %v2901_v63  ;;  %v2923_v3 = vsub.f32 %v2787_v37, %v2907_v1  ;;  %v4995_v36 = vld [vmem:[%s5952_s8] sm:$0xff]   ;;  %v4996_v37 = vld [vmem:[%s5952_s8 + $0x8] sm:$0xff]   ;;  %s4445_s8 = sshll.u32 %s4051_s6, 7 }
 0xa8d   : > { %5090 = vpow2.f32 %v2932_v62  ;;  %4699 = vmatpush3.bf16.msra.mxu0 %v4995_v36  ;;  %4705 = vmatpush3.bf16.msra.mxu1 %v4996_v37 }
 0xa8e   : > { %v2930_v4 = vmul.f32 1.442695, %v2921_v2  ;;  %v2934_v5 = vmul.f32 1.442695, %v2923_v3  ;;  %4710 = vmatprep.subr.bf16.mxu0 %v5532_v0  ;;  %4716 = vmatprep.subr.bf16.mxu1 %v5532_v0 }
 0xa8f   : > { %v2910_v6 = vpop.xlane.xlu0 %2909 }
 0xa90   : > { %5092 = vpow2.f32 %v2930_v4  ;;  %v2924_v7 = vsub.f32 %v2836_v42, %v2910_v6 }
 0xa91   : > { %5094 = vpow2.f32 %v2934_v5 }
 0xa92   : > { %v2936_v8 = vmul.f32 1.442695, %v2924_v7 }
 0xa93   : > { %v2913_v9 = vpop.xlane.xlu1 %2912  ;;  %v2916_v10 = vpop.xlane.xlu0 %2915 }
 0xa94   : > { %5096 = vpow2.f32 %v2936_v8  ;;  %v2925_v11 = vsub.f32 %v2839_v48, %v2913_v9  ;;  %v2926_v12 = vsub.f32 %v2888_v43, %v2916_v10  ;;  %v4999_v8 = vld [vmem:[#allocation13 + $0x78] sm:$0xff]   ;;  %v5000_v9 = vld [vmem:[#allocation13 + $0x70] sm:$0xff]   ;;  %v5001_v10 = vld [vmem:[#allocation13 + $0x68] sm:$0xff]  }
 0xa96   : > { %v2938_v13 = vmul.f32 1.442695, %v2925_v11  ;;  %v2940_v14 = vmul.f32 1.442695, %v2926_v12  ;;  %v5002_v11 = vld [vmem:[#allocation13 + $0x60] sm:$0xff]   ;;  %v5003_v12 = vld [vmem:[#allocation13 + $0x58] sm:$0xff]  }
 0xa97   : > { %v2919_v15 = vpop.xlane.xlu1 %2918 }
 0xa98   : > { %5098 = vpow2.f32 %v2938_v13  ;;  %v2927_v16 = vsub.f32 %v2891_v51, %v2919_v15  ;;  %v5004_v13 = vld [vmem:[#allocation13 + $0x50] sm:$0xff]  }
 0xa99   : > { %v5089_v17 = vpop.eup %5088  ;;  %5100 = vpow2.f32 %v2940_v14 }
 0xa9a   : > { %v2942_v18 = vmul.f32 1.442695, %v2927_v16  ;;  %v2944_v21 = vsel %vm2895_vm10, %v5089_v17, 0.0  ;;  %v5091_v19 = vpop.eup %5090 }
 0xa9b   : > { %2945 = vadd.xlane.f32.xlu0 %v2944_v21  ;;  %v2950_v22 = vsel %vm2895_vm10, %v5091_v19, 0.0 }
 0xa9c   : > { %5102 = vpow2.f32 %v2942_v18 }
 0xa9d   : > { %v5093_v20 = vpop.eup %5092 }
 0xa9e   : > { %v2947_v23 = vsel %vm2895_vm10, %v5093_v20, 0.0  ;;  %v5095_v24 = vpop.eup %5094 }
 0xa9f   : > { %2951 = vadd.xlane.f32.xlu0 %v2950_v22  ;;  %2948 = vadd.xlane.f32.xlu1 %v2947_v23  ;;  %v2953_v27 = vsel %vm2895_vm10, %v5095_v24, 0.0 }
 0xaa1   : > { %v5097_v25 = vpop.eup %5096 }
 0xaa2   : > { %v2956_v26 = vsel %vm2895_vm10, %v5097_v25, 0.0 }
 0xaa3   : > { %2957 = vadd.xlane.f32.xlu0 %v2956_v26  ;;  %2954 = vadd.xlane.f32.xlu1 %v2953_v27 }
 0xaa5   : > { %v5099_v29 = vpop.eup %5098 }
 0xaa6   : > { %v5101_v30 = vpop.eup %5100  ;;  %v2959_v31 = vsel %vm2895_vm10, %v5099_v29, 0.0 }
 0xaa7   : > { %v2962_v32 = vsel %vm2895_vm10, %v5101_v30, 0.0  ;;  %2960 = vadd.xlane.f32.xlu1 %v2959_v31 }
 0xaa8   : > { %2963 = vadd.xlane.f32.xlu0 %v2962_v32 }
 0xaa9   : > { %v5103_v33 = vpop.eup %5102 }
 0xaaa   : > { %v2965_v34 = vsel %vm2895_vm10, %v5103_v33, 0.0 }
 0xaab   : > { %2966 = vadd.xlane.f32.xlu1 %v2965_v34 }
 0xb24   : > { %v2946_v38 = vpop.xlane.xlu0 %2945 }
 0xb25   : > { %5104 = vrcp.f32 %v2946_v38 }
 0xb28   : > { %v2952_v39 = vpop.xlane.xlu0 %2951  ;;  %v2949_v40 = vpop.xlane.xlu1 %2948 }
 0xb29   : > { %5106 = vrcp.f32 %v2949_v40 }
 0xb2a   : > { %5108 = vrcp.f32 %v2952_v39 }
 0xb2c   : > { %v2958_v41 = vpop.xlane.xlu0 %2957  ;;  %v2955_v42 = vpop.xlane.xlu1 %2954 }
 0xb2d   : > { %5110 = vrcp.f32 %v2955_v42 }
 0xb2e   : > { %5112 = vrcp.f32 %v2958_v41 }
 0xb30   : > { %v2961_v43 = vpop.xlane.xlu1 %2960 }
 0xb31   : > { %v2964_v44 = vpop.xlane.xlu0 %2963  ;;  %5114 = vrcp.f32 %v2961_v43 }
 0xb32   : > { %5116 = vrcp.f32 %v2964_v44  ;;  %v5105_v47 = vpop.eup %5104 }
 0xb33   : > { %v2976_v51 = vmul.f32 %v5105_v47, %v5089_v17 }
 0xb34   : > { %v2967_v45 = vpop.xlane.xlu1 %2966 }
 0xb35   : > { %5118 = vrcp.f32 %v2967_v45 }
 0xb36   : > { %v5107_v48 = vpop.eup %5106 }
 0xb37   : > { %v2977_v52 = vmul.f32 %v5107_v48, %v5093_v20  ;;  %v5109_v53 = vpop.eup %5108 }
 0xb38   : > { %v2978_v58 = vmul.f32 %v5109_v53, %v5091_v19 }
 0xb39   : > { %v2984_v55 = vpack.c.bf16 %v2977_v52, %v2976_v51 }
 0xb3a   : > { %v5111_v56 = vpop.eup %5110 }
 0xb3b   : > { %v5113_v57 = vpop.eup %5112  ;;  %4701 = vmatmul.mubr.msk.bf16.vlgmr.msra.gmra.mxu0 %vm2895_vm10, %v2984_v55  ;;  %v2979_v59 = vmul.f32 %v5111_v56, %v5095_v24 }
 0xb3c   : > { %4711 = vmatpush3.bf16.msra.mxu0 %v4997_v54  ;;  %4712 = vmatprep.mubr.msk.bf16.mxu0 %vm5533_vm0, %v5532_v0  ;;  %v2980_v63 = vmul.f32 %v5113_v57, %v5097_v25 }
 0xb3d   : > { %v2985_v62 = vpack.c.bf16 %v2979_v59, %v2978_v58  ;;  %4722 = vmatprep.subr.bf16.mxu0 %v5532_v0 }
 0xb3e   : > { %v5115_v61 = vpop.eup %5114 }
 0xb3f   : > { %v2981_v1 = vmul.f32 %v5115_v61, %v5099_v29  ;;  %v5117_v2 = vpop.eup %5116  ;;  %4707 = vmatmul.mubr.msk.bf16.vlgmr.msra.gmra.mxu1 %vm2895_vm10, %v2985_v62 }
 0xb40   : > { %4717 = vmatpush3.bf16.msra.mxu1 %v4998_v60  ;;  %4718 = vmatprep.mubr.msk.bf16.mxu1 %vm5533_vm0, %v5532_v0  ;;  %v2982_v5 = vmul.f32 %v5117_v2, %v5101_v30 }
 0xb41   : > { %v2986_v3 = vpack.c.bf16 %v2981_v1, %v2980_v63 }
 0xb42   : > { %v5119_v4 = vpop.eup %5118 }
 0xb43   : > { %v2983_v6 = vmul.f32 %v5119_v4, %v5103_v33  ;;  %4713 = vmatmul.mubr.msk.bf16.vlgmr.msra.gmra.mxu0 %vm2895_vm10, %v2986_v3 }
 0xb44   : > { %4738 = vmatprep.mubr.msk.bf16.mxu0 %vm5533_vm0, %v5532_v0  ;;  %4723 = vmatpush3.bf16.msra.mxu0 %v4999_v8 }
 0xb45   : > { %v2987_v7 = vpack.c.bf16 %v2983_v6, %v2982_v5  ;;  %4724 = vmatprep.subr.bf16.mxu0 %v5532_v0 }
 0xb47   : > { %4719 = vmatmul.mubr.msk.bf16.vlgmr.msra.gmra.mxu1 %vm2895_vm10, %v2987_v7 }
 0xb48   : > { %4725 = vmatpush3.bf16.msra.mxu0 %v5000_v9 }
 0xb49   : > { %4726 = vmatprep.subr.bf16.mxu0 %v5532_v0 }
 0xb4c   : > { %4727 = vmatpush3.bf16.msra.mxu0 %v5001_v10 }
 0xb4d   : > { %4728 = vmatprep.subr.bf16.mxu0 %v5532_v0 }
 0xb50   : > { %4729 = vmatpush3.bf16.msra.mxu0 %v5002_v11 }
 0xb51   : > { %4730 = vmatprep.subr.bf16.mxu0 %v5532_v0 }
 0xb54   : > { %4731 = vmatpush3.bf16.msra.mxu0 %v5003_v12 }
 0xb55   : > { %4732 = vmatprep.subr.bf16.mxu0 %v5532_v0 }
 0xb58   : > { %4733 = vmatpush3.bf16.msra.mxu0 %v5004_v13 }
 0xb59   : > { %4734 = vmatprep.subr.bf16.mxu0 %v5532_v0 }
 0xbfb   : > { %v3031_v14 = vpop.f32.mrf.mxu0 }
 0xbfd   : > { %v4702_v15 = vpop.f32.mrf.mxu0 }
 0xbff   : > { %v3034_v16 = vpop.f32.mrf.mxu0  ;;  %v3081_v17 = vpop.f32.mrf.mxu1 }
 0xc01   : > { %v4703_v18 = vpop.f32.mrf.mxu0  ;;  %v4708_v21 = vpop.f32.mrf.mxu1 }
 0xc03   : > { %v3084_v19 = vpop.f32.mrf.mxu1  ;;  %v3131_v20 = vpop.f32.mrf.mxu0 }
 0xc04   : > { %v3188_v24 = vcombine.low %v3031_v14, %v3131_v20  ;;  %v3189_v25 = vcombine.high %v3031_v14, %v3131_v20 }
 0xc05   : > { %v4709_v22 = vpop.f32.mrf.mxu1  ;;  %v4714_v23 = vpop.f32.mrf.mxu0 }
 0xc06   : > { %v3196_v33 = vrot.slane %v3188_v24, %v5998_v35  ;;  %v3203_v34 = vrot.slane %v3189_v25, %v5998_v35 }
 0xc07   : > { %v3134_v26 = vpop.f32.mrf.mxu0  ;;  %v3181_v27 = vpop.f32.mrf.mxu1 }
 0xc08   : > { %v3204_v29 = vcombine.low %v3081_v17, %v3181_v27  ;;  %v3205_v30 = vcombine.high %v3081_v17, %v3181_v27  ;;  %v3256_v38 = vcombine.low %v3034_v16, %v3134_v26  ;;  %v3257_v39 = vcombine.high %v3034_v16, %v3134_v26  ;;  %v5005_v16 = vld [vmem:[#allocation13 + $0x48] sm:$0xff]  }
 0xc09   : > { %v4715_v31 = vpop.f32.mrf.mxu0  ;;  %v4720_v32 = vpop.f32.mrf.mxu1  ;;  %4735 = vmatpush3.bf16.msra.mxu0 %v5005_v16 }
 0xc0a   : > { %v3212_v36 = vrot.slane %v3204_v29, %v5998_v35  ;;  %v3219_v37 = vrot.slane %v3205_v30, %v5998_v35  ;;  %v3264_v55 = vrot.slane %v3256_v38, %v5998_v35  ;;  %v3271_v56 = vrot.slane %v3257_v39, %v5998_v35  ;;  %4736 = vmatprep.subr.bf16.mxu0 %v5532_v0  ;;  %v5006_v31 = vld [vmem:[#allocation13 + $0x40] sm:$0xff]  }
 0xc0b   : > { %v3184_v40 = vpop.f32.mrf.mxu1 }
 0xc0c   : > { %v3220_v41 = vcombine.low %v3196_v33, %v3212_v36  ;;  %v3221_v42 = vcombine.high %v3196_v33, %v3212_v36  ;;  %v3236_v43 = vcombine.low %v3203_v34, %v3219_v37  ;;  %v3237_v44 = vcombine.high %v3203_v34, %v3219_v37 }
 0xc0d   : > { %v3272_v45 = vcombine.low %v3084_v19, %v3184_v40  ;;  %v3273_v47 = vcombine.high %v3084_v19, %v3184_v40  ;;  %v4721_v48 = vpop.f32.mrf.mxu1  ;;  %4737 = vmatpush3.bf16.msra.mxu0 %v5006_v31  ;;  %v5540_v31 = vmov 0  }
 0xc0e   : > { %v3228_v51 = vrot.slane %v3220_v41, %v6003_v46  ;;  %v3235_v52 = vrot.slane %v3221_v42, %v6003_v46  ;;  %v3244_v53 = vrot.slane %v3236_v43, %v6003_v46  ;;  %v3251_v54 = vrot.slane %v3237_v44, %v6003_v46  ;;  %3785 = vmatprep.mubr.bf16.mxu1 %v5540_v31 }
 0xc0f   : > { %v3280_v57 = vrot.slane %v3272_v45, %v5998_v35  ;;  %v3287_v58 = vrot.slane %v3273_v47, %v5998_v35 }
 0xc10   : > { %v3324_v59 = vcombine.low %v3228_v51, %v3235_v52  ;;  %v4388_v60 = vcombine.high %v3228_v51, %v3235_v52  ;;  %v3340_v61 = vcombine.low %v3244_v53, %v3251_v54  ;;  %v4389_v62 = vcombine.high %v3244_v53, %v3251_v54 }
 0xc11   : > { %v3288_v63 = vcombine.low %v3264_v55, %v3280_v57  ;;  %v3289_v1 = vcombine.high %v3264_v55, %v3280_v57  ;;  %v3304_v2 = vcombine.low %v3271_v56, %v3287_v58  ;;  %v3305_v3 = vcombine.high %v3271_v56, %v3287_v58 }
 0xc12   : > { %v3331_v4 = vrot.slane %v3324_v59, %v5998_v35  ;;  %v3339_v5 = vrot.slane %v4388_v60, %v5998_v35  ;;  %v3347_v6 = vrot.slane %v3340_v61, %v5998_v35  ;;  %v3355_v7 = vrot.slane %v4389_v62, %v5998_v35 }
 0xc13   : > { %v3296_v8 = vrot.slane %v3288_v63, %v6003_v46  ;;  %v3303_v9 = vrot.slane %v3289_v1, %v6003_v46  ;;  %v3312_v10 = vrot.slane %v3304_v2, %v6003_v46  ;;  %v3319_v11 = vrot.slane %v3305_v3, %v6003_v46 }
 0xc14   : > { %v3357_v12 = vcombine.high %v3331_v4, %v3339_v5  ;;  %v3373_v13 = vcombine.high %v3347_v6, %v3355_v7  ;;  %v3356_v14 = vcombine.low %v3331_v4, %v3339_v5  ;;  %v3372_v15 = vcombine.low %v3347_v6, %v3355_v7  ;;  %v4392_v4 = vld [vmem:[%s6577_s10 + $0x1] ss:$0 sm:$0xff] }
 0xc15   : > { %v3392_v17 = vcombine.low %v3296_v8, %v3303_v9  ;;  %v4390_v18 = vcombine.high %v3296_v8, %v3303_v9  ;;  %v3408_v21 = vcombine.low %v3312_v10, %v3319_v11  ;;  %v4391_v19 = vcombine.high %v3312_v10, %v3319_v11 }
 0xc16   : > { %v3364_v20 = vrot.slane %v3356_v14, %v6003_v46  ;;  %v3380_v22 = vrot.slane %v3372_v15, %v6003_v46  ;;  %v3371_v27 = vrot.slane %v3357_v12, %v6003_v46  ;;  %v3387_v29 = vrot.slane %v3373_v13, %v6003_v46 }
 0xc17   : > { %v3399_v23 = vrot.slane %v3392_v17, %v5998_v35  ;;  %v3407_v24 = vrot.slane %v4390_v18, %v5998_v35  ;;  %v3415_v25 = vrot.slane %v3408_v21, %v5998_v35  ;;  %v3423_v26 = vrot.slane %v4391_v19, %v5998_v35  ;;  %v5009_v19 = vld [vmem:[#allocation14 + $0x74] ss:$8 sps:$4 sm:$0xff]  }
 0xc18   : > { %v3388_v30 = vcombine.low %v3364_v20, %v3380_v22  ;;  %v3390_v0 = vcombine.low %v3371_v27, %v3387_v29  ;;  %v3389_v41 = vcombine.high %v3364_v20, %v3380_v22  ;;  %v3391_v48 = vcombine.high %v3371_v27, %v3387_v29  ;;  %v5007_v20 = vld [vmem:[#allocation14 + $0x70] ss:$8 sps:$4 sm:$0xff]   ;;  %3753 = vmatprep.subr.bf16.mxu1 %v5009_v19  ;;  %v5010_v22 = vld [vmem:[#allocation14 + $0x60] ss:$8 sps:$4 sm:$0xff]   ;;  %v5021_v27 = vld [vmem:[#allocation14 + $0x34] ss:$8 sps:$4 sm:$0xff]  }
 0xc19   : > { %v3425_v32 = vcombine.high %v3399_v23, %v3407_v24  ;;  %v3441_v33 = vcombine.high %v3415_v25, %v3423_v26  ;;  %v3424_v34 = vcombine.low %v3399_v23, %v3407_v24  ;;  %v3440_v36 = vcombine.low %v3415_v25, %v3423_v26  ;;  %3754 = vmatpush1.bf16.msra.mxu1 %v5007_v20  ;;  %v5015_v23 = vld [vmem:[#allocation14 + $0x54] ss:$8 sps:$4 sm:$0xff]   ;;  %v5013_v24 = vld [vmem:[#allocation14 + $0x50] ss:$8 sps:$4 sm:$0xff]   ;;  %v5018_v25 = vld [vmem:[#allocation14 + $0x44] ss:$8 sps:$4 sm:$0xff]  }
 0xc1a   : > { %v5016_v26 = vld [vmem:[#allocation14 + $0x40] ss:$8 sps:$4 sm:$0xff]   ;;  %v5019_v29 = vld [vmem:[#allocation14 + $0x30] ss:$8 sps:$4 sm:$0xff]  }
 0xc1b   : > { %v3439_v37 = vrot.slane %v3425_v32, %v6003_v46  ;;  %v3455_v38 = vrot.slane %v3441_v33, %v6003_v46  ;;  %v3432_v39 = vrot.slane %v3424_v34, %v6003_v46  ;;  %v3448_v35 = vrot.slane %v3440_v36, %v6003_v46  ;;  %v5022_v32 = vld [vmem:[#allocation14 + $0x20] ss:$8 sps:$4 sm:$0xff]   ;;  %v5027_v33 = vld [vmem:[#allocation14 + $0x14] ss:$8 sps:$4 sm:$0xff]   ;;  %v5025_v34 = vld [vmem:[#allocation14 + $0x10] ss:$8 sps:$4 sm:$0xff]  }
 0xc1c   : > { %v5030_v36 = vld [vmem:[#allocation14 + $0x4] ss:$8 sps:$4 sm:$0xff]  }
 0xc1d   : > { %v3458_v40 = vcombine.low %v3439_v37, %v3455_v38  ;;  %v3457_v42 = vcombine.high %v3432_v39, %v3448_v35  ;;  %v3456_v43 = vcombine.low %v3432_v39, %v3448_v35  ;;  %v3459_v47 = vcombine.high %v3439_v37, %v3455_v38  ;;  %v5028_v37 = vld [vmem:[#allocation14] ss:$8 sps:$4 sm:$0xff]   ;;  %v5031_v38 = vld [vmem:[#allocation16 + $0x78] sm:$0xff]   ;;  %v5033_v35 = vld [vmem:[#allocation16 + $0x70] sm:$0xff]  }
 0xc1e   : > { %v5032_v39 = vld [vmem:[#allocation16 + $0x38] sm:$0xff]   ;;  %4528 = vmatprep.subr.bf16.mxu0 %v5031_v38 }
 0xc1f   : > { %v4940_v44 = vpack.i.bf16 %v3458_v40, %v3390_v0  ;;  %v4935_v45 = vpack.i.bf16 %v3457_v42, %v3389_v41  ;;  %v4945_v51 = vpack.i.bf16 %v3459_v47, %v3391_v48  ;;  %v5034_v0 = vld [vmem:[#allocation16 + $0x30] sm:$0xff]   ;;  %v5035_v40 = vld [vmem:[#allocation16 + $0x68] sm:$0xff]   ;;  %v5037_v42 = vld [vmem:[#allocation16 + $0x60] sm:$0xff]  }
 0xc20   : > { %v5036_v41 = vld [vmem:[#allocation16 + $0x28] sm:$0xff]  }
 0xc21   : > { %4941 = vrot.lane.b32.xlu1 %v4940_v44, %s5534_s17  ;;  %4936 = vrot.lane.b32.xlu0 %v4935_v45, %s5536_s1  ;;  %v5039_v44 = vld [vmem:[#allocation16 + $0x58] sm:$0xff]  }
 0xc22   : > { %v5040_v45 = vld [vmem:[#allocation16 + $0x18] sm:$0xff]  }
 0xc25   : > { %4946 = vrot.lane.b32.xlu1 %v4945_v51, %s5535_s30  ;;  %s6586_s30 = sld [smem:[#allocation53_spill]] }
 0xc2b   : > { %s6393_s1 = scalar_lea.hbm %s6586_s30, %s4445_s8 }
 0xc93   : > { %v4942_v52 = vpop.permute.xlu1 %4941  ;;  %v4937_v53 = vpop.permute.xlu0 %4936 }
 0xc94   : > { %v4939_v54 = vunpack.i.h.bf16 %v4937_v53  ;;  %v4938_v46 = vunpack.i.l.bf16 %v4937_v53  ;;  %v4944_v55 = vunpack.i.h.bf16 %v4942_v52  ;;  %v4943_v56 = vunpack.i.l.bf16 %v4942_v52 }
 0xc96   : > { %v3484_v57 = vsel %vm1236_vm1, %v3388_v30, %v4938_v46  ;;  %v3485_v58 = vsel %vm1236_vm1, %v3456_v43, %v4939_v54  ;;  %v5024_v30 = vld [vmem:[#allocation14 + $0x24] ss:$8 sps:$4 sm:$0xff]  }
 0xc97   : > { %v4947_v59 = vpop.permute.xlu1 %4946  ;;  %v3486_v62 = vsel %vm2081_vm4, %v3484_v57, %v4943_v56  ;;  %v3487_v63 = vsel %vm2081_vm4, %v3485_v58, %v4944_v55  ;;  %v5038_v43 = vld [vmem:[#allocation16 + $0x20] sm:$0xff]  }
 0xc98   : > { %v4949_v60 = vunpack.i.h.bf16 %v4947_v59  ;;  %v4948_v61 = vunpack.i.l.bf16 %v4947_v59 }
 0xc9a   : > { %v3488_v1 = vsel %vm2084_vm5, %v3486_v62, %v4948_v61  ;;  %v3489_v2 = vsel %vm2084_vm5, %v3487_v63, %v4949_v60 }
 0xc9b   : > { %v3490_v3 = vpack.c.bf16 %v3489_v2, %v3488_v1  ;;  %v4403_v1 = vld [vmem:[%s6579_s13 + $0x1] ss:$0 sm:$0xff] }
 0xc9d   : > { %4739 = vmatmul.mubr.bf16.vlgmr.msra.gmra.mxu0 %v3490_v3 }
 0xc9e   : > { %4529 = vmatpush3.bf16.msra.mxu0 %v5032_v39 }
 0xc9f   : > { %4530 = vmatprep.subr.bf16.mxu0 %v5033_v35 }
 0xca2   : > { %4531 = vmatpush3.bf16.msra.mxu0 %v5034_v0 }
 0xca3   : > { %4532 = vmatprep.subr.bf16.mxu0 %v5035_v40 }
 0xca6   : > { %4533 = vmatpush3.bf16.msra.mxu0 %v5036_v41 }
 0xca7   : > { %4534 = vmatprep.subr.bf16.mxu0 %v5037_v42 }
 0xcaa   : > { %4535 = vmatpush3.bf16.msra.mxu0 %v5038_v43 }
 0xcab   : > { %4536 = vmatprep.subr.bf16.mxu0 %v5039_v44 }
 0xcae   : > { %4537 = vmatpush3.bf16.msra.mxu0 %v5040_v45 }
 0xd5d   : > { %v3579_v5 = vpop.f32.mrf.mxu0 }
 0xd5e   : > { %v3580_v6 = vadd.f32 %v4392_v4, %v3579_v5 }
 0xd5f   : > { %v4740_v7 = vpop.f32.mrf.mxu0 }
 0xd60   : > { %v3586_v8 = vadd.f32 %v3580_v6, %v6198_v49  ;;  %v4404_v7 = vld [vmem:[%s6581_s3 + $0x1] ss:$0 sm:$0xff] }
 0xd61   : > { %v3582_v9 = vpop.f32.mrf.mxu0 }
 0xd62   : > { %v3583_v10 = vadd.f32 %v4392_v4, %v3582_v9  ;;  %3592 = vadd.xlane.f32.xlu0 %v3586_v8 }
 0xd63   : > { %v4741_v11 = vpop.f32.mrf.mxu0 }
 0xd64   : > { %v3587_v12 = vadd.f32 %v3583_v10, %v6200_v50  ;;  %v5012_v50 = vld [vmem:[#allocation14 + $0x64] ss:$8 sps:$4 sm:$0xff]  }
 0xd65   : > { %3755 = vmatprep.subr.bf16.mxu1 %v5012_v50 }
 0xd66   : > { %3594 = vadd.xlane.f32.xlu1 %v3587_v12  ;;  %3756 = vmatpush1.bf16.msra.mxu1 %v5010_v22 }
 0xd67   : > { %3757 = vmatprep.subr.bf16.mxu1 %v5015_v23 }
 0xd6a   : > { %3758 = vmatpush1.bf16.msra.mxu1 %v5013_v24 }
 0xd6b   : > { %3759 = vmatprep.subr.bf16.mxu1 %v5018_v25 }
 0xd6e   : > { %3760 = vmatpush1.bf16.msra.mxu1 %v5016_v26 }
 0xd6f   : > { %3761 = vmatprep.subr.bf16.mxu1 %v5021_v27 }
 0xd72   : > { %3762 = vmatpush1.bf16.msra.mxu1 %v5019_v29 }
 0xd73   : > { %3763 = vmatprep.subr.bf16.mxu1 %v5024_v30 }
 0xd76   : > { %3764 = vmatpush1.bf16.msra.mxu1 %v5022_v32 }
 0xd77   : > { %3765 = vmatprep.subr.bf16.mxu1 %v5027_v33 }
 0xd7a   : > { %3766 = vmatpush1.bf16.msra.mxu1 %v5025_v34 }
 0xd7b   : > { %3767 = vmatprep.subr.bf16.mxu1 %v5030_v36 }
 0xd7e   : > { %3768 = vmatpush1.bf16.msra.mxu1 %v5028_v37  ;;  %v4421_v37 = vld [vmem:[%s6583_s19] ss:$0 sm:$0xff]  ;;  %s5385_s19 = sshll.u32 %s5541_s2, 4  ;;  %s5386_s19 = int_to_ptr.vmem [resolvable:$false] %s5385_s19 }
 0xd7f   : > { %s5387_s22 = scalar_lea.vmem %s5386_s19, 512  ;;  %p5388_p9 = scmp.lt.s32.totalorder %s6395_s9, %s5386_s19 }
 0xd80   : > { %p5389_p0 = scmp.lt.s32.totalorder %s5387_s22, %s5381_s20 }
 0xd82   : > { %p5390_p13 = por %p5389_p0, %p5388_p9 }
 0xd84   : > { %p5391_p5 = pnand %p5390_p13, %p5384_p6 }
 0xdeb   : > { %v3593_v13 = vpop.xlane.xlu0 %3592 }
 0xdec   : > { %v3596_v14 = vmul.f32 0.0078125, %v3593_v13  ;;  %v5042_v13 = vld [vmem:[#allocation16 + $0x10] sm:$0xff]  }
 0xdee   : > { %v6357_v15 = vsub.f32 %v3586_v8, %v3596_v14  ;;  %v5043_v14 = vld [vmem:[#allocation16 + $0x48] sm:$0xff]  }
 0xdef   : > { %v3595_v16 = vpop.xlane.xlu1 %3594 }
 0xdf0   : > { %v3597_v17 = vmul.f32 0.0078125, %v3595_v16  ;;  %v3600_v18 = vmul.f32 %v6357_v15, %v6357_v15  ;;  %v3614_v3 = vmul.f32 %v4403_v1, %v6357_v15  ;;  %v5044_v16 = vld [vmem:[#allocation16 + $0x8] sm:$0xff]   ;;  %v5045_v15 = vld [vmem:[#allocation16 + $0x40] sm:$0xff]  }
 0xdf2   : > { %v6361_v21 = vsub.f32 %v3587_v12, %v3597_v17  ;;  %3602 = vadd.xlane.f32.xlu0 %v3600_v18  ;;  %v5041_v12 = vld [vmem:[#allocation16 + $0x50] sm:$0xff]   ;;  %v5046_v17 = vld [vmem:[#allocation16] sm:$0xff]   ;;  %v3669_v18 = vsub.s32 1, %v5995_v28 }
 0xdf3   : > { %4538 = vmatprep.subr.bf16.mxu0 %v5041_v12 }
 0xdf4   : > { %v3601_v49 = vmul.f32 %v6361_v21, %v6361_v21  ;;  %v3615_v4 = vmul.f32 %v4403_v1, %v6361_v21  ;;  %4539 = vmatpush3.bf16.msra.mxu0 %v5042_v13  ;;  %v3665_v21 = vsub.s32 0, %v5995_v28 }
 0xdf5   : > { %4540 = vmatprep.subr.bf16.mxu0 %v5043_v14 }
 0xdf6   : > { %3604 = vadd.xlane.f32.xlu0 %v3601_v49  ;;  %v3661_v49 = vld [vmem:[%s6582_s24] sm:$0x3]  ;;  %s4039_s24 = scalar_lea.sflag [#allocation4], %s5926_s25 }
 0xdf7   : > { %v3670_v20 = vrot.slane %v3661_v49, %v3669_v18  ;;  %v3666_v50 = vrot.slane %v3661_v49, %v3665_v21 }
 0xdf8   : > { %4541 = vmatpush3.bf16.msra.mxu0 %v5044_v16 }
 0xdf9   : > { %4542 = vmatprep.subr.bf16.mxu0 %v5045_v15 }
 0xdfc   : > { %4543 = vmatpush3.bf16.msra.mxu0 %v5046_v17 }
 0xe7b   : > { %v3603_v47 = vpop.xlane.xlu0 %3602 }
 0xe7c   : > { %v3606_v48 = vmul.f32 0.007874016, %v3603_v47 }
 0xe7e   : > { %5120 = vrsqrt.f32 %v3606_v48  ;;  %vm3618_vm11 = vcmp.eq.f32.partialorder %v3606_v48, inf  ;;  %v3621_v46 = vand.u32 2147483648, %v3606_v48  ;;  %vm3620_vm12 = vcmp.eq.f32.partialorder %v3606_v48, 0.0 }
 0xe7f   : > { %v3605_v51 = vpop.xlane.xlu0 %3604 }
 0xe80   : > { %v3607_v52 = vmul.f32 0.007874016, %v3605_v51 }
 0xe82   : > { %5122 = vrsqrt.f32 %v3607_v52  ;;  %vm3625_vm13 = vcmp.eq.f32.partialorder %v3607_v52, inf  ;;  %v3628_v60 = vand.u32 2147483648, %v3607_v52  ;;  %vm3627_vm14 = vcmp.eq.f32.partialorder %v3607_v52, 0.0 }
 0xe8b   : > { %v5121_v53 = vpop.eup %5120 }
 0xe8c   : > { %v3617_v54 = vmul.f32 %v5121_v53, %v3606_v48 }
 0xe8e   : > { %v3619_v55 = vsel %vm3618_vm11, %v3606_v48, %v3617_v54 }
 0xe8f   : > { %v5123_v56 = vpop.eup %5122  ;;  %v3622_v57 = vsel %vm3620_vm12, %v3621_v46, %v3619_v55 }
 0xe90   : > { %v3630_v58 = vadd.f32 1e-06, %v3622_v57  ;;  %v3624_v59 = vmul.f32 %v5123_v56, %v3607_v52 }
 0xe92   : > { %5124 = vrcp.f32 %v3630_v58  ;;  %v3626_v61 = vsel %vm3625_vm13, %v3607_v52, %v3624_v59 }
 0xe93   : > { %v3629_v62 = vsel %vm3627_vm14, %v3628_v60, %v3626_v61 }
 0xe94   : > { %v3631_v63 = vadd.f32 1e-06, %v3629_v62 }
 0xe96   : > { %5126 = vrcp.f32 %v3631_v63 }
 0xe9f   : > { %v5125_v2 = vpop.eup %5124 }
 0xea0   : > { %v3633_v5 = vmul.f32 %v5125_v2, %v3614_v3 }
 0xea2   : > { %v3642_v9 = vadd.f32 %v4404_v7, %v3633_v5 }
 0xea3   : > { %v5127_v6 = vpop.eup %5126 }
 0xea4   : > { %v3635_v8 = vmul.f32 %v5127_v6, %v3615_v4 }
 0xea6   : > { %v3643_v10 = vadd.f32 %v4404_v7, %v3635_v8  ;;  %v4440_v8 = vld [vmem:[%s6579_s13 + $0x2] ss:$0 sm:$0xff] }
 0xea8   : > { %v3644_v11 = vpack.c.bf16 %v3643_v10, %v3642_v9 }
 0xeaa   : > { %3786 = vmatmul.mubr.bf16.vlgmr.msra.gmra.mxu1 %v3644_v11  ;;  %v4441_v11 = vld [vmem:[%s6581_s3 + $0x2] ss:$0 sm:$0xff] }
 0xf6a   : > { %v3787_v19 = vpop.f32.mrf.mxu1 }
 0xf6b   : > { %v3788_v26 = vadd.f32 %v3787_v19, %v3666_v50 }
 0xf6c   : > { %v3789_v22 = vpop.f32.mrf.mxu1 }
 0xf6d   : > { %v3790_v24 = vadd.f32 %v3789_v22, %v3670_v20  ;;  %v3796_v33 = vmax.f32 %v3788_v26, 0.0 }
 0xf6e   : > { %v3791_v23 = vpop.f32.mrf.mxu1 }
 0xf6f   : > { %v3792_v25 = vadd.f32 %v3791_v23, %v3666_v50  ;;  %v3797_v31 = vmax.f32 %v3790_v24, 0.0 }
 0xf70   : > { %v3793_v27 = vpop.f32.mrf.mxu1 }
 0xf71   : > { %v3794_v29 = vadd.f32 %v3793_v27, %v3670_v20  ;;  %v3798_v30 = vmax.f32 %v3792_v25, 0.0 }
 0xf73   : > { %v3799_v32 = vmax.f32 %v3794_v29, 0.0  ;;  %v3800_v28 = vpack.c.bf16 %v3798_v30, %v3796_v33 }
 0xf75   : > { %v3801_v34 = vpack.c.bf16 %v3799_v32, %v3797_v31 }
 0xf77   : > { %3969 = vmatprep.mubr.bf16.mxu0 %v3801_v34 }
 0xf78   : > { %3970 = vmatmul.mubr.bf16.vlgmr.msra.gmra.mxu0 %v3800_v28 }
0x1038   : > { %v4544_v36 = vpop.f32.mrf.mxu0 }
0x103a   : > { %v4545_v38 = vpop.f32.mrf.mxu0 }
0x103b   : > { %v4546_v39 = vadd.f32 %v4545_v38, %v4544_v36 }
0x103c   : > { %v4547_v35 = vpop.f32.mrf.mxu0 }
0x103d   : > { %v3972_v0 = vadd.f32 %v4546_v39, %v4421_v37 }
0x103e   : > { %v4548_v40 = vpop.f32.mrf.mxu0 }
0x103f   : > { %v4549_v41 = vadd.f32 %v4548_v40, %v4547_v35  ;;  %v3978_v42 = vadd.f32 %v3972_v0, %v3642_v9 }
0x1041   : > { %v3975_v43 = vadd.f32 %v4549_v41, %v4421_v37  ;;  %3984 = vadd.xlane.f32.xlu1 %v3978_v42 }
0x1043   : > { %v3979_v44 = vadd.f32 %v3975_v43, %v3643_v10 }
0x1045   : > { %3986 = vadd.xlane.f32.xlu0 %v3979_v44 }
0x10ca   : > { %v3985_v45 = vpop.xlane.xlu1 %3984 }
0x10cb   : > { %v3988_v47 = vmul.f32 0.0078125, %v3985_v45 }
0x10cd   : > { %v3990_v48 = vsub.f32 %v3978_v42, %v3988_v47 }
0x10ce   : > { %v3987_v51 = vpop.xlane.xlu0 %3986 }
0x10cf   : > { %v3989_v52 = vmul.f32 0.0078125, %v3987_v51  ;;  %v3992_v53 = vmul.f32 %v3990_v48, %v3990_v48  ;;  %v4006_v9 = vmul.f32 %v4440_v8, %v3990_v48 }
0x10d1   : > { %v3991_v54 = vsub.f32 %v3979_v44, %v3989_v52  ;;  %3994 = vadd.xlane.f32.xlu1 %v3992_v53 }
0x10d3   : > { %v3993_v46 = vmul.f32 %v3991_v54, %v3991_v54  ;;  %v4007_v13 = vmul.f32 %v4440_v8, %v3991_v54 }
0x10d5   : > { %3996 = vadd.xlane.f32.xlu0 %v3993_v46 }
0x115a   : > { %v3995_v55 = vpop.xlane.xlu1 %3994 }
0x115b   : > { %v3998_v56 = vmul.f32 0.007874016, %v3995_v55 }
0x115d   : > { %5128 = vrsqrt.f32 %v3998_v56  ;;  %vm4010_vm15 = vcmp.eq.f32.partialorder %v3998_v56, inf  ;;  %v4013_v61 = vand.u32 2147483648, %v3998_v56  ;;  %vm4012_vm0 = vcmp.eq.f32.partialorder %v3998_v56, 0.0 }
0x115e   : > { %v3997_v57 = vpop.xlane.xlu0 %3996 }
0x115f   : > { %v3999_v58 = vmul.f32 0.007874016, %v3997_v57 }
0x1161   : > { %5130 = vrsqrt.f32 %v3999_v58  ;;  %vm4017_vm1 = vcmp.eq.f32.partialorder %v3999_v58, inf  ;;  %v4020_v4 = vand.u32 2147483648, %v3999_v58  ;;  %vm4019_vm2 = vcmp.eq.f32.partialorder %v3999_v58, 0.0 }
0x116a   : > { %v5129_v59 = vpop.eup %5128 }
0x116b   : > { %v4009_v60 = vmul.f32 %v5129_v59, %v3998_v56 }
0x116d   : > { %v4011_v62 = vsel %vm4010_vm15, %v3998_v56, %v4009_v60 }
0x116e   : > { %v5131_v63 = vpop.eup %5130  ;;  %v4014_v1 = vsel %vm4012_vm0, %v4013_v61, %v4011_v62 }
0x116f   : > { %v4022_v2 = vadd.f32 1e-06, %v4014_v1  ;;  %v4016_v3 = vmul.f32 %v5131_v63, %v3999_v58 }
0x1171   : > { %5132 = vrcp.f32 %v4022_v2  ;;  %v4018_v5 = vsel %vm4017_vm1, %v3999_v58, %v4016_v3 }
0x1172   : > { %v4021_v6 = vsel %vm4019_vm2, %v4020_v4, %v4018_v5 }
0x1173   : > { %v4023_v7 = vadd.f32 1e-06, %v4021_v6 }
0x1175   : > { %5134 = vrcp.f32 %v4023_v7 }
0x117e   : > { %v5133_v10 = vpop.eup %5132 }
0x117f   : > { %v4025_v12 = vmul.f32 %v5133_v10, %v4006_v9 }
0x1181   : > { %v4034_v14 = vadd.f32 %v4441_v11, %v4025_v12 }
0x1182   : > { %v5135_v16 = vpop.eup %5134 }
0x1183   : > { %v4027_v15 = vmul.f32 %v5135_v16, %v4007_v13  ;;  %4036 = vst [vmem:[%s742_s12] sm:$0xff] %v4034_v14 }
0x1185   : > { %v4035_v17 = vadd.f32 %v4441_v11, %v4027_v15 }
0x1187   : > { %4037 = vst [vmem:[%s742_s12 + $0x8] sm:$0xff] %v4035_v17 }
0x1188   : > { %5394 = shalt.err (!%p5391_p5)
}
0x1189   : > { %s5395_s16 = scalar_lea.hbm %s6393_s1, 256  ;;  %s5399_s21 = scalar_lea.hbm %s6586_s30, 1024 }
0x118a   : > { %p5396_p3 = scmp.ne.s32.totalorder %s6393_s1, %s5395_s16  ;;  %p5400_p11 = scmp.lt.s32.totalorder %s6393_s1, %s6586_s30 }
0x118b   : > { %p5401_p7 = scmp.lt.s32.totalorder %s5399_s21, %s5395_s16 }
0x118c   : > { %p5397_p4 = pnand %p5396_p3, %p6587_p1 }
0x118d   : > { %p5402_p12 = por %p5401_p7, %p5400_p11 }
0x118e   : > { %p5398_p10 = pneg %p5397_p4 }
0x1190   : > { %p5403_p8 = pnand %p5402_p12, %p5398_p10 }
0x1192   : > { %5406 = shalt.err (!%p5403_p8)
}
0x1193   : > { %s5542_s7 = smov 128   ;;  %s5543_s6 = smov 8  }
0x1194   : > { %4768 = dma.vmem_to_hbm [thread:$0]  (%p6587_p1), %s6395_s9, 256, %s6393_s1, %s4039_s24, %s5542_s7, %s5542_s7, %s5543_s6  }
0x1195 PF: > { %s6588_s8 = sld [smem:[#allocation26_spill]]  ;;  %p4812_p2 = scmp.ge.s32.totalorder %s5517_s28, 2 }
0x1196   : > { %s6589_s12 = sld [smem:[#allocation37_spill]] }
0x119b   : > { %s4069_s0 = sand.u32 1, %s6588_s8  }
0x119c   : > { %p6590_p6 = scmp.ne.s32.totalorder %s6589_s12, 0  ;;  %s4070_s17 = scalar_lea.sflag [#allocation4], %s4069_s0 }
0x119e   : > { %p4800_p9 = pnand %p4812_p2, %p6590_p6 }
0x11a0   : > { %p4801_p0 = pneg %p4800_p9 }
0x11a2   : > { %5472 = dma.done.wait (%p4801_p0), %s4070_s17, 256  }
0x11a3   : > { %5474 = vsyncadd (%p4801_p0), %s4070_s17, 4294967040  ;;  %s39_s28 = sadd.s32 1, %s5517_s28   ;;  %s6591_s18 = sld [smem:[#allocation24_spill]] }
0x11a4   : > { %p36_p13 = scmp.ge.s32.totalorder %s39_s28, 6   ;;  %s6592_s19 = sld [smem:[#allocation25_spill]] }
0x11a5   : > { %s6593_s21 = sld [smem:[#allocation27_spill]]  ;;  %s6597_s20 = smov %s6610_s29 }
0x11a6   : > { %s6594_s22 = sld [smem:[#allocation28_spill]]  ;;  %s6598_s23 = smov %s5860_s15 }
0x11a7   : > { %s6595_s11 = sld [smem:[#allocation34_spill]]  ;;  %s6599_s24 = smov %s5509_s26 }
0x11a8   : > { %s6596_s9 = sld [smem:[#allocation36_spill]]  ;;  %s6600_s25 = smov %s5513_s27 }
0x11aa   :  { %38 = sbr.rel (!%p36_p13) target bundleno = 32 (0x20), region = 197 }
0x11ad   : > { %s6601_s26 = smov %s6595_s11 }
0x11ae   : > { %s6602_s27 = smov %s6596_s9 }
0x11af   :  { %4075 = vsyncpa [#allocation3], 1 }
0x11b0   :  { %4077 = vsyncpa [#allocation3 + $0x1], 1 }
0x11b1   :  { %4078 = vsyncpa [#allocation6], 1 }
0x11b2   :  { %4080 = vsyncpa [#allocation6 + $0x1], 1 }
0x11b3   :  { %4081 = vsyncpa [#allocation9], 1 }
0x11b4   :  { %4083 = vsyncpa [#allocation9 + $0x1], 1 }
0x11b5   :  { %4084 = vsyncpa [#allocation12], 1 }
0x11b6   :  { %4085 = vsyncpa [#allocation15], 1 }
0x11b7   :  { %4086 = vsyncpa [#allocation4], 1 }
0x11b8   :  { %4088 = vsyncpa [#allocation4 + $0x1], 1 }

</bundles_post_ra>
